<compile_context>
chip_gen: v6e
topology: v6e:2x2x1
jax: 0.10.0
libtpu: 0.0.40
codegen_flags: <defaults>
</compile_context>

<pallas_src>
import math

import jax
import jax.numpy as jnp
from jax.experimental import pallas as pl
from jax.experimental.pallas import tpu as pltpu

# -----------------------------------------------------------------------------
# Config mirroring Encoder.__init__ (small, deterministic, synthetic):
WORD_NUM = 64     # word_num (vocab size)
EMBED_DIM = 32    # config.embed_dim
HIDDEN = 32       # config.hidden_size
LAYERS = 2        # config.hidden_layers
BIDIR = True      # config.bidirectional
NUM_DIR = 2 if BIDIR else 1
SEQ_LEN = 8       # len(inputs)

GH = NUM_DIR * HIDDEN        # 64 : fused (both-direction) hidden width
GATES = 3 * GH               # 192: fused gate width, layout [r | z | n], each [d0 | d1]
IN_DIMS = [EMBED_DIM] + [NUM_DIR * HIDDEN] * (LAYERS - 1)
# -----------------------------------------------------------------------------


def encoder_kernel(ids_ref, emb_ref, h0_ref, *args):
    """args = [w_in_f, b_in_f, w_hh_f, b_hn_f] * LAYERS, out_ref, hn_ref."""
    n_w = 4 * LAYERS
    w_refs = args[:n_w]
    out_ref = args[n_w]           # (SEQ_LEN, NUM_DIR*HIDDEN)  last-layer output
    hn_ref = args[n_w + 1]        # (LAYERS,  NUM_DIR*HIDDEN)  final fused hidden

    H, S = HIDDEN, SEQ_LEN

    # ---- embedding gather: 8 dynamic row loads held as values (no stores) ----
    rows = [emb_ref[pl.ds(ids_ref[t], 1), :] for t in range(S)]        # (1, E) each
    # Fused-direction layer-0 input: xcat row i = [x(i) | x(S-1-i)].
    xcat = jnp.concatenate(
        [jnp.concatenate(rows, axis=0),
         jnp.concatenate(rows[::-1], axis=0)], axis=1)                 # (S, 2E)

    hn_rows = []
    for layer in range(LAYERS):                     # static Python loop (unrolled)
        w_in_ref, b_in_ref, w_hh_ref, b_hn_ref = w_refs[4 * layer: 4 * layer + 4]

        # ---- all-timesteps, both-directions input-gate matmul (hoisted) -----
        # bf16 MXU inputs, f32 accumulate.  b_in already carries b_hh for the
        # r/z gates (folded at weight-fusing time).
        gi = jnp.dot(xcat.astype(jnp.bfloat16), w_in_ref[...],
                     preferred_element_type=jnp.float32) + b_in_ref[...]   # (S, 6H)
        b_hn = b_hn_ref[...]                                               # (1, GH)

        # ---- fused fwd+bwd recurrence, fully unrolled -------------------------
        # h = [h_fwd | h_bwd]; step i: fwd processes t=i, bwd processes t=S-1-i.
        # TODO(synk): hold w_hh in MXU staging registers (pltpu.matmul_push_rhs
        # once per layer + matmul_acc_lhs/matmul_pop per step; MRB accumulate
        # onto gi on v7x) to remove the per-step RHS feed; jnp.dot kept here
        # for portability across v5e/v6e/v7x.
        h = h0_ref[pl.ds(layer, 1), :]                                     # (1, GH) f32
        hs = []
        for i in range(S):
            # Re-read w_hh each step: load hides under MXU latency and avoids
            # holding a (64,192) weight live across the unrolled loop.
            gh = jnp.dot(h.astype(jnp.bfloat16), w_hh_ref[...],
                         preferred_element_type=jnp.float32)               # (1, 6H)
            gi_i = gi[i:i + 1, :]
            rz = jax.nn.sigmoid(gi_i[:, :2 * GH] + gh[:, :2 * GH])         # fused r|z
            r = rz[:, :GH]
            z = rz[:, GH:]
            n = jnp.tanh(gi_i[:, 2 * GH:] + r * (gh[:, 2 * GH:] + b_hn))
            h = (1.0 - z) * n + z * h                                      # (1, GH)
            hs.append(h)

        # final hidden of this layer: fwd half saw t=S-1 last, bwd half saw t=0 last
        hn_rows.append(h)

        # ---- un-fuse step-ordered history into time order (values only) ------
        fwd_t = [hs[t][:, :H] for t in range(S)]           # fwd(t)
        bwd_t = [hs[S - 1 - t][:, H:] for t in range(S)]   # bwd(t)
        y = jnp.concatenate([jnp.concatenate(fwd_t, axis=0),
                             jnp.concatenate(bwd_t, axis=0)], axis=1)      # (S, GH)
        if layer == LAYERS - 1:
            out_ref[...] = y                                # single wide store
        else:
            y_rev = jnp.concatenate([jnp.concatenate(fwd_t[::-1], axis=0),
                                     jnp.concatenate(bwd_t[::-1], axis=0)],
                                    axis=1)                 # row i = y(S-1-i)
            xcat = jnp.concatenate([y, y_rev], axis=1)      # (S, 2*GH) next input

    hn_ref[...] = jnp.concatenate(hn_rows, axis=0)          # single (LAYERS, GH) store


# ------------------------- wrapper-side weight fusing -------------------------
def _fuse_layer(w_ih_T, w_hh_T, b_ih, b_hh, in_dim):
    """Build fused / block-diagonal weights.

    Column layout (width 6H): gate-major [r | z | n], within each gate [d0 | d1].
    w_in_f : (2*in_dim, 6H) bf16 so [x(i) | x(S-1-i)] @ w_in_f gives both
             directions' input gates in one matmul.
    b_in_f : (1, 6H) f32; carries b_ih for all gates and b_hh folded in for r/z.
    w_hh_f : (2H, 6H) bf16 block-diagonal so [h_fwd | h_bwd] @ w_hh_f gives both
             directions' recurrent gates in one matmul (no bias).
    b_hn_f : (1, 2H) f32; b_hh of the n gate only (added inside the r* term).
    """
    H, D, G = HIDDEN, NUM_DIR, 3
    w_in = jnp.zeros((D * in_dim, GATES), jnp.float32)
    w_hh = jnp.zeros((D * H, GATES), jnp.float32)
    b_in = jnp.zeros((1, GATES), jnp.float32)
    b_hn = jnp.zeros((1, D * H), jnp.float32)
    for d in range(D):
        for g in range(G):
            c = g * D * H + d * H
            w_in = w_in.at[d * in_dim:(d + 1) * in_dim, c:c + H].set(
                w_ih_T[d][:, g * H:(g + 1) * H])
            w_hh = w_hh.at[d * H:(d + 1) * H, c:c + H].set(
                w_hh_T[d][:, g * H:(g + 1) * H])
            bi = b_ih[d][g * H:(g + 1) * H]
            if g < 2:                                 # fold b_hh for r/z into b_in
                bi = bi + b_hh[d][g * H:(g + 1) * H]
            else:                                     # n-gate b_hh stays separate
                b_hn = b_hn.at[0, d * H:(d + 1) * H].set(b_hh[d][2 * H:3 * H])
            b_in = b_in.at[0, c:c + H].set(bi)
    return (w_in.astype(jnp.bfloat16), b_in,
            w_hh.astype(jnp.bfloat16), b_hn)


def encoder_forward(ids, emb, h0, params):
    """ids: (S,) int32; emb: (V,E); h0: (L*D, 1, H); params: per-layer tuples."""
    flat_w = []
    for layer, p in enumerate(params):
        flat_w.extend(_fuse_layer(*p, in_dim=IN_DIMS[layer]))

    # fused initial hidden: row l = [h0(l, d0) | h0(l, d1)]
    h0_fused = h0.reshape(LAYERS, NUM_DIR * HIDDEN)

    in_specs = ([pl.BlockSpec(memory_space=pltpu.MemorySpace.SMEM)]
                + [pl.BlockSpec(memory_space=pltpu.MemorySpace.VMEM)]
                * (2 + len(flat_w)))
    out_shapes = (
        jax.ShapeDtypeStruct((SEQ_LEN, NUM_DIR * HIDDEN), jnp.float32),
        jax.ShapeDtypeStruct((LAYERS, NUM_DIR * HIDDEN), jnp.float32),
    )
    out_specs = (pl.BlockSpec(memory_space=pltpu.MemorySpace.VMEM),
                 pl.BlockSpec(memory_space=pltpu.MemorySpace.VMEM))

    out_flat, hn_flat = pl.pallas_call(
        encoder_kernel,
        out_shape=out_shapes,
        in_specs=in_specs,
        out_specs=out_specs,
    )(ids, emb, h0_fused, *flat_w)

    outputs = out_flat.reshape(SEQ_LEN, 1, NUM_DIR * HIDDEN)   # PyTorch GRU `output`
    hidden = hn_flat.reshape(LAYERS * NUM_DIR, 1, HIDDEN)      # PyTorch GRU `h_n`
    return outputs, hidden


# ------------------------- pure-JAX reference (for check) --------------------
def encoder_ref(ids, emb, h0, params, matmul_dtype=jnp.float32):
    """Reference GRU.  matmul_dtype=bfloat16 mirrors the kernel's MXU input
    precision (f32 accumulate, f32 gate math) for a tight structural check."""
    H = HIDDEN
    h0 = h0.reshape(LAYERS * NUM_DIR, HIDDEN)
    layer_in = emb[ids]                                  # (S, E)
    hn = []
    for layer in range(LAYERS):
        w_ih_T, w_hh_T, b_ih, b_hh = params[layer]
        outs = []
        for d in range(NUM_DIR):
            h = h0[layer * NUM_DIR + d]
            ts = range(SEQ_LEN) if d == 0 else reversed(range(SEQ_LEN))
            ys = [None] * SEQ_LEN
            for t in ts:
                gi = jnp.dot(layer_in[t].astype(matmul_dtype),
                             w_ih_T[d].astype(matmul_dtype),
                             preferred_element_type=jnp.float32) + b_ih[d]
                gh = jnp.dot(h.astype(matmul_dtype),
                             w_hh_T[d].astype(matmul_dtype),
                             preferred_element_type=jnp.float32) + b_hh[d]
                r = jax.nn.sigmoid(gi[:H] + gh[:H])
                z = jax.nn.sigmoid(gi[H:2 * H] + gh[H:2 * H])
                n = jnp.tanh(gi[2 * H:] + r * gh[2 * H:])
                h = (1.0 - z) * n + z * h
                ys[t] = h
            outs.append(jnp.stack(ys))
            hn.append(h)
        layer_in = jnp.concatenate(outs, axis=-1)
    return layer_in.reshape(SEQ_LEN, 1, NUM_DIR * HIDDEN), \
        jnp.stack(hn).reshape(LAYERS * NUM_DIR, 1, HIDDEN)


# ------------------------------ parameter init --------------------------------
def init_params(key):
    k_emb, key = jax.random.split(key)
    emb = jax.random.normal(k_emb, (WORD_NUM, EMBED_DIM), jnp.float32)
    bound = 1.0 / math.sqrt(HIDDEN)
    params = []
    for layer in range(LAYERS):
        in_dim = IN_DIMS[layer]
        ks = jax.random.split(key, 5)
        key = ks[0]
        w_ih_T = jax.random.uniform(ks[1], (NUM_DIR, in_dim, 3 * HIDDEN),
                                    jnp.float32, -bound, bound)
        w_hh_T = jax.random.uniform(ks[2], (NUM_DIR, HIDDEN, 3 * HIDDEN),
                                    jnp.float32, -bound, bound)
        b_ih = jax.random.uniform(ks[3], (NUM_DIR, 3 * HIDDEN),
                                  jnp.float32, -bound, bound)
        b_hh = jax.random.uniform(ks[4], (NUM_DIR, 3 * HIDDEN),
                                  jnp.float32, -bound, bound)
        params.append((w_ih_T, w_hh_T, b_ih, b_hh))
    return emb, params, key


if __name__ == "__main__":
    key = jax.random.PRNGKey(0)
    emb, params, key = init_params(key)

    k_ids, _ = jax.random.split(key)
    ids = jax.random.randint(k_ids, (SEQ_LEN,), 0, WORD_NUM, dtype=jnp.int32)
    # Encoder.init_hidden(): zeros of shape (k * hidden_layers, 1, hidden_size)
    hidden0 = jnp.zeros((LAYERS * NUM_DIR, 1, HIDDEN), jnp.float32)

    out, h_n = encoder_forward(ids, emb, hidden0, params)
    out = jax.block_until_ready(out)
    h_n = jax.block_until_ready(h_n)

    assert out.shape == (SEQ_LEN, 1, NUM_DIR * HIDDEN)
    assert h_n.shape == (LAYERS * NUM_DIR, 1, HIDDEN)

    # Tight check against a reference using the same bf16 matmul-input precision
    # (validates the fused-direction GRU structure).
    out_m, hn_m = encoder_ref(ids, emb, hidden0, params, matmul_dtype=jnp.bfloat16)
    assert jnp.allclose(out, out_m, atol=5e-3, rtol=5e-3)
    assert jnp.allclose(h_n, hn_m, atol=5e-3, rtol=5e-3)

    # Looser check against the pure-f32 reference (bounds the deviation
    # introduced by casting MXU inputs to bf16; gate math stays f32).
    out_f, hn_f = encoder_ref(ids, emb, hidden0, params)
    assert jnp.allclose(out, out_f, atol=3e-2, rtol=3e-2)
    assert jnp.allclose(h_n, hn_f, atol=3e-2, rtol=3e-2)

    print("KERNEL_OK")
</pallas_src>

<mosaic_0001>
module attributes {stable_mosaic.version = 11 : i64} {
  func.func @encoder_kernel(%arg0: memref<8xi32, #tpu.memory_space<smem>>, %arg1: memref<64x32xf32, #tpu.memory_space<vmem>>, %arg2: memref<2x64xf32, #tpu.memory_space<vmem>>, %arg3: memref<64x192xbf16, #tpu.memory_space<vmem>>, %arg4: memref<1x192xf32, #tpu.memory_space<vmem>>, %arg5: memref<64x192xbf16, #tpu.memory_space<vmem>>, %arg6: memref<1x64xf32, #tpu.memory_space<vmem>>, %arg7: memref<128x192xbf16, #tpu.memory_space<vmem>>, %arg8: memref<1x192xf32, #tpu.memory_space<vmem>>, %arg9: memref<64x192xbf16, #tpu.memory_space<vmem>>, %arg10: memref<1x64xf32, #tpu.memory_space<vmem>>, %arg11: memref<8x64xf32, #tpu.memory_space<vmem>>, %arg12: memref<2x64xf32, #tpu.memory_space<vmem>>) attributes {dimension_semantics = [], scalar_prefetch = 0 : i64, scratch_operands = 0 : i64, tpu.core_type = #tpu.core_type<tc>} {
    %c0 = arith.constant 0 : index
    %0 = memref.load %arg0[%c0] : memref<8xi32, #tpu.memory_space<smem>>
    %1 = arith.index_cast %0 : i32 to index
    %c0_0 = arith.constant 0 : index
    %2 = vector.load %arg1[%1, %c0_0] : memref<64x32xf32, #tpu.memory_space<vmem>>, vector<1x32xf32>
    %c1 = arith.constant 1 : index
    %3 = memref.load %arg0[%c1] : memref<8xi32, #tpu.memory_space<smem>>
    %4 = arith.index_cast %3 : i32 to index
    %c0_1 = arith.constant 0 : index
    %5 = vector.load %arg1[%4, %c0_1] : memref<64x32xf32, #tpu.memory_space<vmem>>, vector<1x32xf32>
    %c2 = arith.constant 2 : index
    %6 = memref.load %arg0[%c2] : memref<8xi32, #tpu.memory_space<smem>>
    %7 = arith.index_cast %6 : i32 to index
    %c0_2 = arith.constant 0 : index
    %8 = vector.load %arg1[%7, %c0_2] : memref<64x32xf32, #tpu.memory_space<vmem>>, vector<1x32xf32>
    %c3 = arith.constant 3 : index
    %9 = memref.load %arg0[%c3] : memref<8xi32, #tpu.memory_space<smem>>
    %10 = arith.index_cast %9 : i32 to index
    %c0_3 = arith.constant 0 : index
    %11 = vector.load %arg1[%10, %c0_3] : memref<64x32xf32, #tpu.memory_space<vmem>>, vector<1x32xf32>
    %c4 = arith.constant 4 : index
    %12 = memref.load %arg0[%c4] : memref<8xi32, #tpu.memory_space<smem>>
    %13 = arith.index_cast %12 : i32 to index
    %c0_4 = arith.constant 0 : index
    %14 = vector.load %arg1[%13, %c0_4] : memref<64x32xf32, #tpu.memory_space<vmem>>, vector<1x32xf32>
    %c5 = arith.constant 5 : index
    %15 = memref.load %arg0[%c5] : memref<8xi32, #tpu.memory_space<smem>>
    %16 = arith.index_cast %15 : i32 to index
    %c0_5 = arith.constant 0 : index
    %17 = vector.load %arg1[%16, %c0_5] : memref<64x32xf32, #tpu.memory_space<vmem>>, vector<1x32xf32>
    %c6 = arith.constant 6 : index
    %18 = memref.load %arg0[%c6] : memref<8xi32, #tpu.memory_space<smem>>
    %19 = arith.index_cast %18 : i32 to index
    %c0_6 = arith.constant 0 : index
    %20 = vector.load %arg1[%19, %c0_6] : memref<64x32xf32, #tpu.memory_space<vmem>>, vector<1x32xf32>
    %c7 = arith.constant 7 : index
    %21 = memref.load %arg0[%c7] : memref<8xi32, #tpu.memory_space<smem>>
    %22 = arith.index_cast %21 : i32 to index
    %c0_7 = arith.constant 0 : index
    %23 = vector.load %arg1[%22, %c0_7] : memref<64x32xf32, #tpu.memory_space<vmem>>, vector<1x32xf32>
    %24 = tpu.concatenate %2, %5, %8, %11, %14, %17, %20, %23 in 0 : vector<1x32xf32>, vector<1x32xf32>, vector<1x32xf32>, vector<1x32xf32>, vector<1x32xf32>, vector<1x32xf32>, vector<1x32xf32>, vector<1x32xf32> -> vector<8x32xf32>
    %25 = tpu.concatenate %23, %20, %17, %14, %11, %8, %5, %2 in 0 : vector<1x32xf32>, vector<1x32xf32>, vector<1x32xf32>, vector<1x32xf32>, vector<1x32xf32>, vector<1x32xf32>, vector<1x32xf32>, vector<1x32xf32> -> vector<8x32xf32>
    %26 = tpu.concatenate %24, %25 in 1 : vector<8x32xf32>, vector<8x32xf32> -> vector<8x64xf32>
    %27 = arith.truncf %26 : vector<8x64xf32> to vector<8x64xbf16>
    %c0_8 = arith.constant 0 : index
    %c0_9 = arith.constant 0 : index
    %28 = vector.load %arg3[%c0_8, %c0_9] : memref<64x192xbf16, #tpu.memory_space<vmem>>, vector<64x192xbf16>
    %cst = arith.constant dense<0.000000e+00> : vector<8x192xf32>
    %29 = tpu.matmul %27, %28, %cst {dimension_numbers = #tpu.dot_dimension_numbers<[1], [0], [0], [1], [0, 0, 1, 1], [], []>} : vector<8x64xbf16>, vector<64x192xbf16>, vector<8x192xf32> -> vector<8x192xf32>
    %c0_10 = arith.constant 0 : index
    %c0_11 = arith.constant 0 : index
    %30 = vector.load %arg4[%c0_10, %c0_11] : memref<1x192xf32, #tpu.memory_space<vmem>>, vector<1x192xf32>
    %31 = vector.broadcast %30 : vector<1x192xf32> to vector<8x192xf32>
    %32 = arith.addf %29, %31 : vector<8x192xf32>
    %c0_12 = arith.constant 0 : index
    %c0_13 = arith.constant 0 : index
    %33 = vector.load %arg6[%c0_12, %c0_13] : memref<1x64xf32, #tpu.memory_space<vmem>>, vector<1x64xf32>
    %c0_14 = arith.constant 0 : index
    %c0_15 = arith.constant 0 : index
    %34 = vector.load %arg2[%c0_14, %c0_15] : memref<2x64xf32, #tpu.memory_space<vmem>>, vector<1x64xf32>
    %35 = arith.truncf %34 : vector<1x64xf32> to vector<1x64xbf16>
    %c0_16 = arith.constant 0 : index
    %c0_17 = arith.constant 0 : index
    %36 = vector.load %arg5[%c0_16, %c0_17] : memref<64x192xbf16, #tpu.memory_space<vmem>>, vector<64x192xbf16>
    %cst_18 = arith.constant dense<0.000000e+00> : vector<1x192xf32>
    %37 = tpu.matmul %35, %36, %cst_18 {dimension_numbers = #tpu.dot_dimension_numbers<[1], [0], [0], [1], [0, 0, 1, 1], [], []>} : vector<1x64xbf16>, vector<64x192xbf16>, vector<1x192xf32> -> vector<1x192xf32>
    %38 = vector.extract_strided_slice %32 {offsets = [0, 0], sizes = [1, 192], strides = [1, 1]} : vector<8x192xf32> to vector<1x192xf32>
    %39 = vector.extract_strided_slice %38 {offsets = [0, 0], sizes = [1, 128], strides = [1, 1]} : vector<1x192xf32> to vector<1x128xf32>
    %40 = vector.extract_strided_slice %37 {offsets = [0, 0], sizes = [1, 128], strides = [1, 1]} : vector<1x192xf32> to vector<1x128xf32>
    %41 = arith.addf %39, %40 : vector<1x128xf32>
    %42 = arith.negf %41 : vector<1x128xf32>
    %43 = math.exp %42 : vector<1x128xf32>
    %cst_19 = arith.constant 1.000000e+00 : f32
    %44 = vector.broadcast %cst_19 : f32 to vector<1x128xf32>
    %45 = arith.addf %44, %43 : vector<1x128xf32>
    %46 = arith.divf %44, %45 : vector<1x128xf32>
    %47 = vector.extract_strided_slice %46 {offsets = [0, 0], sizes = [1, 64], strides = [1, 1]} : vector<1x128xf32> to vector<1x64xf32>
    %48 = vector.extract_strided_slice %46 {offsets = [0, 64], sizes = [1, 64], strides = [1, 1]} : vector<1x128xf32> to vector<1x64xf32>
    %49 = vector.extract_strided_slice %38 {offsets = [0, 128], sizes = [1, 64], strides = [1, 1]} : vector<1x192xf32> to vector<1x64xf32>
    %50 = vector.extract_strided_slice %37 {offsets = [0, 128], sizes = [1, 64], strides = [1, 1]} : vector<1x192xf32> to vector<1x64xf32>
    %51 = arith.addf %50, %33 : vector<1x64xf32>
    %52 = arith.mulf %47, %51 : vector<1x64xf32>
    %53 = arith.addf %49, %52 : vector<1x64xf32>
    %54 = math.tanh %53 : vector<1x64xf32>
    %cst_20 = arith.constant 1.000000e+00 : f32
    %55 = vector.broadcast %cst_20 : f32 to vector<1x64xf32>
    %56 = arith.subf %55, %48 : vector<1x64xf32>
    %57 = arith.mulf %56, %54 : vector<1x64xf32>
    %58 = arith.mulf %48, %34 : vector<1x64xf32>
    %59 = arith.addf %57, %58 : vector<1x64xf32>
    %60 = arith.truncf %59 : vector<1x64xf32> to vector<1x64xbf16>
    %c0_21 = arith.constant 0 : index
    %c0_22 = arith.constant 0 : index
    %61 = vector.load %arg5[%c0_21, %c0_22] : memref<64x192xbf16, #tpu.memory_space<vmem>>, vector<64x192xbf16>
    %cst_23 = arith.constant dense<0.000000e+00> : vector<1x192xf32>
    %62 = tpu.matmul %60, %61, %cst_23 {dimension_numbers = #tpu.dot_dimension_numbers<[1], [0], [0], [1], [0, 0, 1, 1], [], []>} : vector<1x64xbf16>, vector<64x192xbf16>, vector<1x192xf32> -> vector<1x192xf32>
    %63 = vector.extract_strided_slice %32 {offsets = [1, 0], sizes = [1, 192], strides = [1, 1]} : vector<8x192xf32> to vector<1x192xf32>
    %64 = vector.extract_strided_slice %63 {offsets = [0, 0], sizes = [1, 128], strides = [1, 1]} : vector<1x192xf32> to vector<1x128xf32>
    %65 = vector.extract_strided_slice %62 {offsets = [0, 0], sizes = [1, 128], strides = [1, 1]} : vector<1x192xf32> to vector<1x128xf32>
    %66 = arith.addf %64, %65 : vector<1x128xf32>
    %67 = arith.negf %66 : vector<1x128xf32>
    %68 = math.exp %67 : vector<1x128xf32>
    %cst_24 = arith.constant 1.000000e+00 : f32
    %69 = vector.broadcast %cst_24 : f32 to vector<1x128xf32>
    %70 = arith.addf %69, %68 : vector<1x128xf32>
    %71 = arith.divf %69, %70 : vector<1x128xf32>
    %72 = vector.extract_strided_slice %71 {offsets = [0, 0], sizes = [1, 64], strides = [1, 1]} : vector<1x128xf32> to vector<1x64xf32>
    %73 = vector.extract_strided_slice %71 {offsets = [0, 64], sizes = [1, 64], strides = [1, 1]} : vector<1x128xf32> to vector<1x64xf32>
    %74 = vector.extract_strided_slice %63 {offsets = [0, 128], sizes = [1, 64], strides = [1, 1]} : vector<1x192xf32> to vector<1x64xf32>
    %75 = vector.extract_strided_slice %62 {offsets = [0, 128], sizes = [1, 64], strides = [1, 1]} : vector<1x192xf32> to vector<1x64xf32>
    %76 = arith.addf %75, %33 : vector<1x64xf32>
    %77 = arith.mulf %72, %76 : vector<1x64xf32>
    %78 = arith.addf %74, %77 : vector<1x64xf32>
    %79 = math.tanh %78 : vector<1x64xf32>
    %cst_25 = arith.constant 1.000000e+00 : f32
    %80 = vector.broadcast %cst_25 : f32 to vector<1x64xf32>
    %81 = arith.subf %80, %73 : vector<1x64xf32>
    %82 = arith.mulf %81, %79 : vector<1x64xf32>
    %83 = arith.mulf %73, %59 : vector<1x64xf32>
    %84 = arith.addf %82, %83 : vector<1x64xf32>
    %85 = arith.truncf %84 : vector<1x64xf32> to vector<1x64xbf16>
    %c0_26 = arith.constant 0 : index
    %c0_27 = arith.constant 0 : index
    %86 = vector.load %arg5[%c0_26, %c0_27] : memref<64x192xbf16, #tpu.memory_space<vmem>>, vector<64x192xbf16>
    %cst_28 = arith.constant dense<0.000000e+00> : vector<1x192xf32>
    %87 = tpu.matmul %85, %86, %cst_28 {dimension_numbers = #tpu.dot_dimension_numbers<[1], [0], [0], [1], [0, 0, 1, 1], [], []>} : vector<1x64xbf16>, vector<64x192xbf16>, vector<1x192xf32> -> vector<1x192xf32>
    %88 = vector.extract_strided_slice %32 {offsets = [2, 0], sizes = [1, 192], strides = [1, 1]} : vector<8x192xf32> to vector<1x192xf32>
    %89 = vector.extract_strided_slice %88 {offsets = [0, 0], sizes = [1, 128], strides = [1, 1]} : vector<1x192xf32> to vector<1x128xf32>
    %90 = vector.extract_strided_slice %87 {offsets = [0, 0], sizes = [1, 128], strides = [1, 1]} : vector<1x192xf32> to vector<1x128xf32>
    %91 = arith.addf %89, %90 : vector<1x128xf32>
    %92 = arith.negf %91 : vector<1x128xf32>
    %93 = math.exp %92 : vector<1x128xf32>
    %cst_29 = arith.constant 1.000000e+00 : f32
    %94 = vector.broadcast %cst_29 : f32 to vector<1x128xf32>
    %95 = arith.addf %94, %93 : vector<1x128xf32>
    %96 = arith.divf %94, %95 : vector<1x128xf32>
    %97 = vector.extract_strided_slice %96 {offsets = [0, 0], sizes = [1, 64], strides = [1, 1]} : vector<1x128xf32> to vector<1x64xf32>
    %98 = vector.extract_strided_slice %96 {offsets = [0, 64], sizes = [1, 64], strides = [1, 1]} : vector<1x128xf32> to vector<1x64xf32>
    %99 = vector.extract_strided_slice %88 {offsets = [0, 128], sizes = [1, 64], strides = [1, 1]} : vector<1x192xf32> to vector<1x64xf32>
    %100 = vector.extract_strided_slice %87 {offsets = [0, 128], sizes = [1, 64], strides = [1, 1]} : vector<1x192xf32> to vector<1x64xf32>
    %101 = arith.addf %100, %33 : vector<1x64xf32>
    %102 = arith.mulf %97, %101 : vector<1x64xf32>
    %103 = arith.addf %99, %102 : vector<1x64xf32>
    %104 = math.tanh %103 : vector<1x64xf32>
    %cst_30 = arith.constant 1.000000e+00 : f32
    %105 = vector.broadcast %cst_30 : f32 to vector<1x64xf32>
    %106 = arith.subf %105, %98 : vector<1x64xf32>
    %107 = arith.mulf %106, %104 : vector<1x64xf32>
    %108 = arith.mulf %98, %84 : vector<1x64xf32>
    %109 = arith.addf %107, %108 : vector<1x64xf32>
    %110 = arith.truncf %109 : vector<1x64xf32> to vector<1x64xbf16>
    %c0_31 = arith.constant 0 : index
    %c0_32 = arith.constant 0 : index
    %111 = vector.load %arg5[%c0_31, %c0_32] : memref<64x192xbf16, #tpu.memory_space<vmem>>, vector<64x192xbf16>
    %cst_33 = arith.constant dense<0.000000e+00> : vector<1x192xf32>
    %112 = tpu.matmul %110, %111, %cst_33 {dimension_numbers = #tpu.dot_dimension_numbers<[1], [0], [0], [1], [0, 0, 1, 1], [], []>} : vector<1x64xbf16>, vector<64x192xbf16>, vector<1x192xf32> -> vector<1x192xf32>
    %113 = vector.extract_strided_slice %32 {offsets = [3, 0], sizes = [1, 192], strides = [1, 1]} : vector<8x192xf32> to vector<1x192xf32>
    %114 = vector.extract_strided_slice %113 {offsets = [0, 0], sizes = [1, 128], strides = [1, 1]} : vector<1x192xf32> to vector<1x128xf32>
    %115 = vector.extract_strided_slice %112 {offsets = [0, 0], sizes = [1, 128], strides = [1, 1]} : vector<1x192xf32> to vector<1x128xf32>
    %116 = arith.addf %114, %115 : vector<1x128xf32>
    %117 = arith.negf %116 : vector<1x128xf32>
    %118 = math.exp %117 : vector<1x128xf32>
    %cst_34 = arith.constant 1.000000e+00 : f32
    %119 = vector.broadcast %cst_34 : f32 to vector<1x128xf32>
    %120 = arith.addf %119, %118 : vector<1x128xf32>
    %121 = arith.divf %119, %120 : vector<1x128xf32>
    %122 = vector.extract_strided_slice %121 {offsets = [0, 0], sizes = [1, 64], strides = [1, 1]} : vector<1x128xf32> to vector<1x64xf32>
    %123 = vector.extract_strided_slice %121 {offsets = [0, 64], sizes = [1, 64], strides = [1, 1]} : vector<1x128xf32> to vector<1x64xf32>
    %124 = vector.extract_strided_slice %113 {offsets = [0, 128], sizes = [1, 64], strides = [1, 1]} : vector<1x192xf32> to vector<1x64xf32>
    %125 = vector.extract_strided_slice %112 {offsets = [0, 128], sizes = [1, 64], strides = [1, 1]} : vector<1x192xf32> to vector<1x64xf32>
    %126 = arith.addf %125, %33 : vector<1x64xf32>
    %127 = arith.mulf %122, %126 : vector<1x64xf32>
    %128 = arith.addf %124, %127 : vector<1x64xf32>
    %129 = math.tanh %128 : vector<1x64xf32>
    %cst_35 = arith.constant 1.000000e+00 : f32
    %130 = vector.broadcast %cst_35 : f32 to vector<1x64xf32>
    %131 = arith.subf %130, %123 : vector<1x64xf32>
    %132 = arith.mulf %131, %129 : vector<1x64xf32>
    %133 = arith.mulf %123, %109 : vector<1x64xf32>
    %134 = arith.addf %132, %133 : vector<1x64xf32>
    %135 = arith.truncf %134 : vector<1x64xf32> to vector<1x64xbf16>
    %c0_36 = arith.constant 0 : index
    %c0_37 = arith.constant 0 : index
    %136 = vector.load %arg5[%c0_36, %c0_37] : memref<64x192xbf16, #tpu.memory_space<vmem>>, vector<64x192xbf16>
    %cst_38 = arith.constant dense<0.000000e+00> : vector<1x192xf32>
    %137 = tpu.matmul %135, %136, %cst_38 {dimension_numbers = #tpu.dot_dimension_numbers<[1], [0], [0], [1], [0, 0, 1, 1], [], []>} : vector<1x64xbf16>, vector<64x192xbf16>, vector<1x192xf32> -> vector<1x192xf32>
    %138 = vector.extract_strided_slice %32 {offsets = [4, 0], sizes = [1, 192], strides = [1, 1]} : vector<8x192xf32> to vector<1x192xf32>
    %139 = vector.extract_strided_slice %138 {offsets = [0, 0], sizes = [1, 128], strides = [1, 1]} : vector<1x192xf32> to vector<1x128xf32>
    %140 = vector.extract_strided_slice %137 {offsets = [0, 0], sizes = [1, 128], strides = [1, 1]} : vector<1x192xf32> to vector<1x128xf32>
    %141 = arith.addf %139, %140 : vector<1x128xf32>
    %142 = arith.negf %141 : vector<1x128xf32>
    %143 = math.exp %142 : vector<1x128xf32>
    %cst_39 = arith.constant 1.000000e+00 : f32
    %144 = vector.broadcast %cst_39 : f32 to vector<1x128xf32>
    %145 = arith.addf %144, %143 : vector<1x128xf32>
    %146 = arith.divf %144, %145 : vector<1x128xf32>
    %147 = vector.extract_strided_slice %146 {offsets = [0, 0], sizes = [1, 64], strides = [1, 1]} : vector<1x128xf32> to vector<1x64xf32>
    %148 = vector.extract_strided_slice %146 {offsets = [0, 64], sizes = [1, 64], strides = [1, 1]} : vector<1x128xf32> to vector<1x64xf32>
    %149 = vector.extract_strided_slice %138 {offsets = [0, 128], sizes = [1, 64], strides = [1, 1]} : vector<1x192xf32> to vector<1x64xf32>
    %150 = vector.extract_strided_slice %137 {offsets = [0, 128], sizes = [1, 64], strides = [1, 1]} : vector<1x192xf32> to vector<1x64xf32>
    %151 = arith.addf %150, %33 : vector<1x64xf32>
    %152 = arith.mulf %147, %151 : vector<1x64xf32>
    %153 = arith.addf %149, %152 : vector<1x64xf32>
    %154 = math.tanh %153 : vector<1x64xf32>
    %cst_40 = arith.constant 1.000000e+00 : f32
    %155 = vector.broadcast %cst_40 : f32 to vector<1x64xf32>
    %156 = arith.subf %155, %148 : vector<1x64xf32>
    %157 = arith.mulf %156, %154 : vector<1x64xf32>
    %158 = arith.mulf %148, %134 : vector<1x64xf32>
    %159 = arith.addf %157, %158 : vector<1x64xf32>
    %160 = arith.truncf %159 : vector<1x64xf32> to vector<1x64xbf16>
    %c0_41 = arith.constant 0 : index
    %c0_42 = arith.constant 0 : index
    %161 = vector.load %arg5[%c0_41, %c0_42] : memref<64x192xbf16, #tpu.memory_space<vmem>>, vector<64x192xbf16>
    %cst_43 = arith.constant dense<0.000000e+00> : vector<1x192xf32>
    %162 = tpu.matmul %160, %161, %cst_43 {dimension_numbers = #tpu.dot_dimension_numbers<[1], [0], [0], [1], [0, 0, 1, 1], [], []>} : vector<1x64xbf16>, vector<64x192xbf16>, vector<1x192xf32> -> vector<1x192xf32>
    %163 = vector.extract_strided_slice %32 {offsets = [5, 0], sizes = [1, 192], strides = [1, 1]} : vector<8x192xf32> to vector<1x192xf32>
    %164 = vector.extract_strided_slice %163 {offsets = [0, 0], sizes = [1, 128], strides = [1, 1]} : vector<1x192xf32> to vector<1x128xf32>
    %165 = vector.extract_strided_slice %162 {offsets = [0, 0], sizes = [1, 128], strides = [1, 1]} : vector<1x192xf32> to vector<1x128xf32>
    %166 = arith.addf %164, %165 : vector<1x128xf32>
    %167 = arith.negf %166 : vector<1x128xf32>
    %168 = math.exp %167 : vector<1x128xf32>
    %cst_44 = arith.constant 1.000000e+00 : f32
    %169 = vector.broadcast %cst_44 : f32 to vector<1x128xf32>
    %170 = arith.addf %169, %168 : vector<1x128xf32>
    %171 = arith.divf %169, %170 : vector<1x128xf32>
    %172 = vector.extract_strided_slice %171 {offsets = [0, 0], sizes = [1, 64], strides = [1, 1]} : vector<1x128xf32> to vector<1x64xf32>
    %173 = vector.extract_strided_slice %171 {offsets = [0, 64], sizes = [1, 64], strides = [1, 1]} : vector<1x128xf32> to vector<1x64xf32>
    %174 = vector.extract_strided_slice %163 {offsets = [0, 128], sizes = [1, 64], strides = [1, 1]} : vector<1x192xf32> to vector<1x64xf32>
    %175 = vector.extract_strided_slice %162 {offsets = [0, 128], sizes = [1, 64], strides = [1, 1]} : vector<1x192xf32> to vector<1x64xf32>
    %176 = arith.addf %175, %33 : vector<1x64xf32>
    %177 = arith.mulf %172, %176 : vector<1x64xf32>
    %178 = arith.addf %174, %177 : vector<1x64xf32>
    %179 = math.tanh %178 : vector<1x64xf32>
    %cst_45 = arith.constant 1.000000e+00 : f32
    %180 = vector.broadcast %cst_45 : f32 to vector<1x64xf32>
    %181 = arith.subf %180, %173 : vector<1x64xf32>
    %182 = arith.mulf %181, %179 : vector<1x64xf32>
    %183 = arith.mulf %173, %159 : vector<1x64xf32>
    %184 = arith.addf %182, %183 : vector<1x64xf32>
    %185 = arith.truncf %184 : vector<1x64xf32> to vector<1x64xbf16>
    %c0_46 = arith.constant 0 : index
    %c0_47 = arith.constant 0 : index
    %186 = vector.load %arg5[%c0_46, %c0_47] : memref<64x192xbf16, #tpu.memory_space<vmem>>, vector<64x192xbf16>
    %cst_48 = arith.constant dense<0.000000e+00> : vector<1x192xf32>
    %187 = tpu.matmul %185, %186, %cst_48 {dimension_numbers = #tpu.dot_dimension_numbers<[1], [0], [0], [1], [0, 0, 1, 1], [], []>} : vector<1x64xbf16>, vector<64x192xbf16>, vector<1x192xf32> -> vector<1x192xf32>
    %188 = vector.extract_strided_slice %32 {offsets = [6, 0], sizes = [1, 192], strides = [1, 1]} : vector<8x192xf32> to vector<1x192xf32>
    %189 = vector.extract_strided_slice %188 {offsets = [0, 0], sizes = [1, 128], strides = [1, 1]} : vector<1x192xf32> to vector<1x128xf32>
    %190 = vector.extract_strided_slice %187 {offsets = [0, 0], sizes = [1, 128], strides = [1, 1]} : vector<1x192xf32> to vector<1x128xf32>
    %191 = arith.addf %189, %190 : vector<1x128xf32>
    %192 = arith.negf %191 : vector<1x128xf32>
    %193 = math.exp %192 : vector<1x128xf32>
    %cst_49 = arith.constant 1.000000e+00 : f32
    %194 = vector.broadcast %cst_49 : f32 to vector<1x128xf32>
    %195 = arith.addf %194, %193 : vector<1x128xf32>
    %196 = arith.divf %194, %195 : vector<1x128xf32>
    %197 = vector.extract_strided_slice %196 {offsets = [0, 0], sizes = [1, 64], strides = [1, 1]} : vector<1x128xf32> to vector<1x64xf32>
    %198 = vector.extract_strided_slice %196 {offsets = [0, 64], sizes = [1, 64], strides = [1, 1]} : vector<1x128xf32> to vector<1x64xf32>
    %199 = vector.extract_strided_slice %188 {offsets = [0, 128], sizes = [1, 64], strides = [1, 1]} : vector<1x192xf32> to vector<1x64xf32>
    %200 = vector.extract_strided_slice %187 {offsets = [0, 128], sizes = [1, 64], strides = [1, 1]} : vector<1x192xf32> to vector<1x64xf32>
    %201 = arith.addf %200, %33 : vector<1x64xf32>
    %202 = arith.mulf %197, %201 : vector<1x64xf32>
    %203 = arith.addf %199, %202 : vector<1x64xf32>
    %204 = math.tanh %203 : vector<1x64xf32>
    %cst_50 = arith.constant 1.000000e+00 : f32
    %205 = vector.broadcast %cst_50 : f32 to vector<1x64xf32>
    %206 = arith.subf %205, %198 : vector<1x64xf32>
    %207 = arith.mulf %206, %204 : vector<1x64xf32>
    %208 = arith.mulf %198, %184 : vector<1x64xf32>
    %209 = arith.addf %207, %208 : vector<1x64xf32>
    %210 = arith.truncf %209 : vector<1x64xf32> to vector<1x64xbf16>
    %c0_51 = arith.constant 0 : index
    %c0_52 = arith.constant 0 : index
    %211 = vector.load %arg5[%c0_51, %c0_52] : memref<64x192xbf16, #tpu.memory_space<vmem>>, vector<64x192xbf16>
    %cst_53 = arith.constant dense<0.000000e+00> : vector<1x192xf32>
    %212 = tpu.matmul %210, %211, %cst_53 {dimension_numbers = #tpu.dot_dimension_numbers<[1], [0], [0], [1], [0, 0, 1, 1], [], []>} : vector<1x64xbf16>, vector<64x192xbf16>, vector<1x192xf32> -> vector<1x192xf32>
    %213 = vector.extract_strided_slice %32 {offsets = [7, 0], sizes = [1, 192], strides = [1, 1]} : vector<8x192xf32> to vector<1x192xf32>
    %214 = vector.extract_strided_slice %213 {offsets = [0, 0], sizes = [1, 128], strides = [1, 1]} : vector<1x192xf32> to vector<1x128xf32>
    %215 = vector.extract_strided_slice %212 {offsets = [0, 0], sizes = [1, 128], strides = [1, 1]} : vector<1x192xf32> to vector<1x128xf32>
    %216 = arith.addf %214, %215 : vector<1x128xf32>
    %217 = arith.negf %216 : vector<1x128xf32>
    %218 = math.exp %217 : vector<1x128xf32>
    %cst_54 = arith.constant 1.000000e+00 : f32
    %219 = vector.broadcast %cst_54 : f32 to vector<1x128xf32>
    %220 = arith.addf %219, %218 : vector<1x128xf32>
    %221 = arith.divf %219, %220 : vector<1x128xf32>
    %222 = vector.extract_strided_slice %221 {offsets = [0, 0], sizes = [1, 64], strides = [1, 1]} : vector<1x128xf32> to vector<1x64xf32>
    %223 = vector.extract_strided_slice %221 {offsets = [0, 64], sizes = [1, 64], strides = [1, 1]} : vector<1x128xf32> to vector<1x64xf32>
    %224 = vector.extract_strided_slice %213 {offsets = [0, 128], sizes = [1, 64], strides = [1, 1]} : vector<1x192xf32> to vector<1x64xf32>
    %225 = vector.extract_strided_slice %212 {offsets = [0, 128], sizes = [1, 64], strides = [1, 1]} : vector<1x192xf32> to vector<1x64xf32>
    %226 = arith.addf %225, %33 : vector<1x64xf32>
    %227 = arith.mulf %222, %226 : vector<1x64xf32>
    %228 = arith.addf %224, %227 : vector<1x64xf32>
    %229 = math.tanh %228 : vector<1x64xf32>
    %cst_55 = arith.constant 1.000000e+00 : f32
    %230 = vector.broadcast %cst_55 : f32 to vector<1x64xf32>
    %231 = arith.subf %230, %223 : vector<1x64xf32>
    %232 = arith.mulf %231, %229 : vector<1x64xf32>
    %233 = arith.mulf %223, %209 : vector<1x64xf32>
    %234 = arith.addf %232, %233 : vector<1x64xf32>
    %235 = vector.extract_strided_slice %59 {offsets = [0, 0], sizes = [1, 32], strides = [1, 1]} : vector<1x64xf32> to vector<1x32xf32>
    %236 = vector.extract_strided_slice %84 {offsets = [0, 0], sizes = [1, 32], strides = [1, 1]} : vector<1x64xf32> to vector<1x32xf32>
    %237 = vector.extract_strided_slice %109 {offsets = [0, 0], sizes = [1, 32], strides = [1, 1]} : vector<1x64xf32> to vector<1x32xf32>
    %238 = vector.extract_strided_slice %134 {offsets = [0, 0], sizes = [1, 32], strides = [1, 1]} : vector<1x64xf32> to vector<1x32xf32>
    %239 = vector.extract_strided_slice %159 {offsets = [0, 0], sizes = [1, 32], strides = [1, 1]} : vector<1x64xf32> to vector<1x32xf32>
    %240 = vector.extract_strided_slice %184 {offsets = [0, 0], sizes = [1, 32], strides = [1, 1]} : vector<1x64xf32> to vector<1x32xf32>
    %241 = vector.extract_strided_slice %209 {offsets = [0, 0], sizes = [1, 32], strides = [1, 1]} : vector<1x64xf32> to vector<1x32xf32>
    %242 = vector.extract_strided_slice %234 {offsets = [0, 0], sizes = [1, 32], strides = [1, 1]} : vector<1x64xf32> to vector<1x32xf32>
    %243 = vector.extract_strided_slice %234 {offsets = [0, 32], sizes = [1, 32], strides = [1, 1]} : vector<1x64xf32> to vector<1x32xf32>
    %244 = vector.extract_strided_slice %209 {offsets = [0, 32], sizes = [1, 32], strides = [1, 1]} : vector<1x64xf32> to vector<1x32xf32>
    %245 = vector.extract_strided_slice %184 {offsets = [0, 32], sizes = [1, 32], strides = [1, 1]} : vector<1x64xf32> to vector<1x32xf32>
    %246 = vector.extract_strided_slice %159 {offsets = [0, 32], sizes = [1, 32], strides = [1, 1]} : vector<1x64xf32> to vector<1x32xf32>
    %247 = vector.extract_strided_slice %134 {offsets = [0, 32], sizes = [1, 32], strides = [1, 1]} : vector<1x64xf32> to vector<1x32xf32>
    %248 = vector.extract_strided_slice %109 {offsets = [0, 32], sizes = [1, 32], strides = [1, 1]} : vector<1x64xf32> to vector<1x32xf32>
    %249 = vector.extract_strided_slice %84 {offsets = [0, 32], sizes = [1, 32], strides = [1, 1]} : vector<1x64xf32> to vector<1x32xf32>
    %250 = vector.extract_strided_slice %59 {offsets = [0, 32], sizes = [1, 32], strides = [1, 1]} : vector<1x64xf32> to vector<1x32xf32>
    %251 = tpu.concatenate %235, %236, %237, %238, %239, %240, %241, %242 in 0 : vector<1x32xf32>, vector<1x32xf32>, vector<1x32xf32>, vector<1x32xf32>, vector<1x32xf32>, vector<1x32xf32>, vector<1x32xf32>, vector<1x32xf32> -> vector<8x32xf32>
    %252 = tpu.concatenate %243, %244, %245, %246, %247, %248, %249, %250 in 0 : vector<1x32xf32>, vector<1x32xf32>, vector<1x32xf32>, vector<1x32xf32>, vector<1x32xf32>, vector<1x32xf32>, vector<1x32xf32>, vector<1x32xf32> -> vector<8x32xf32>
    %253 = tpu.concatenate %251, %252 in 1 : vector<8x32xf32>, vector<8x32xf32> -> vector<8x64xf32>
    %254 = tpu.concatenate %242, %241, %240, %239, %238, %237, %236, %235 in 0 : vector<1x32xf32>, vector<1x32xf32>, vector<1x32xf32>, vector<1x32xf32>, vector<1x32xf32>, vector<1x32xf32>, vector<1x32xf32>, vector<1x32xf32> -> vector<8x32xf32>
    %255 = tpu.concatenate %250, %249, %248, %247, %246, %245, %244, %243 in 0 : vector<1x32xf32>, vector<1x32xf32>, vector<1x32xf32>, vector<1x32xf32>, vector<1x32xf32>, vector<1x32xf32>, vector<1x32xf32>, vector<1x32xf32> -> vector<8x32xf32>
    %256 = tpu.concatenate %254, %255 in 1 : vector<8x32xf32>, vector<8x32xf32> -> vector<8x64xf32>
    %257 = tpu.concatenate %253, %256 in 1 : vector<8x64xf32>, vector<8x64xf32> -> vector<8x128xf32>
    %258 = arith.truncf %257 : vector<8x128xf32> to vector<8x128xbf16>
    %c0_56 = arith.constant 0 : index
    %c0_57 = arith.constant 0 : index
    %259 = vector.load %arg7[%c0_56, %c0_57] : memref<128x192xbf16, #tpu.memory_space<vmem>>, vector<128x192xbf16>
    %cst_58 = arith.constant dense<0.000000e+00> : vector<8x192xf32>
    %260 = tpu.matmul %258, %259, %cst_58 {dimension_numbers = #tpu.dot_dimension_numbers<[1], [0], [0], [1], [0, 0, 1, 1], [], []>} : vector<8x128xbf16>, vector<128x192xbf16>, vector<8x192xf32> -> vector<8x192xf32>
    %c0_59 = arith.constant 0 : index
    %c0_60 = arith.constant 0 : index
    %261 = vector.load %arg8[%c0_59, %c0_60] : memref<1x192xf32, #tpu.memory_space<vmem>>, vector<1x192xf32>
    %262 = vector.broadcast %261 : vector<1x192xf32> to vector<8x192xf32>
    %263 = arith.addf %260, %262 : vector<8x192xf32>
    %c0_61 = arith.constant 0 : index
    %c0_62 = arith.constant 0 : index
    %264 = vector.load %arg10[%c0_61, %c0_62] : memref<1x64xf32, #tpu.memory_space<vmem>>, vector<1x64xf32>
    %c1_63 = arith.constant 1 : index
    %c0_64 = arith.constant 0 : index
    %265 = vector.load %arg2[%c1_63, %c0_64] : memref<2x64xf32, #tpu.memory_space<vmem>>, vector<1x64xf32>
    %266 = arith.truncf %265 : vector<1x64xf32> to vector<1x64xbf16>
    %c0_65 = arith.constant 0 : index
    %c0_66 = arith.constant 0 : index
    %267 = vector.load %arg9[%c0_65, %c0_66] : memref<64x192xbf16, #tpu.memory_space<vmem>>, vector<64x192xbf16>
    %cst_67 = arith.constant dense<0.000000e+00> : vector<1x192xf32>
    %268 = tpu.matmul %266, %267, %cst_67 {dimension_numbers = #tpu.dot_dimension_numbers<[1], [0], [0], [1], [0, 0, 1, 1], [], []>} : vector<1x64xbf16>, vector<64x192xbf16>, vector<1x192xf32> -> vector<1x192xf32>
    %269 = vector.extract_strided_slice %263 {offsets = [0, 0], sizes = [1, 192], strides = [1, 1]} : vector<8x192xf32> to vector<1x192xf32>
    %270 = vector.extract_strided_slice %269 {offsets = [0, 0], sizes = [1, 128], strides = [1, 1]} : vector<1x192xf32> to vector<1x128xf32>
    %271 = vector.extract_strided_slice %268 {offsets = [0, 0], sizes = [1, 128], strides = [1, 1]} : vector<1x192xf32> to vector<1x128xf32>
    %272 = arith.addf %270, %271 : vector<1x128xf32>
    %273 = arith.negf %272 : vector<1x128xf32>
    %274 = math.exp %273 : vector<1x128xf32>
    %cst_68 = arith.constant 1.000000e+00 : f32
    %275 = vector.broadcast %cst_68 : f32 to vector<1x128xf32>
    %276 = arith.addf %275, %274 : vector<1x128xf32>
    %277 = arith.divf %275, %276 : vector<1x128xf32>
    %278 = vector.extract_strided_slice %277 {offsets = [0, 0], sizes = [1, 64], strides = [1, 1]} : vector<1x128xf32> to vector<1x64xf32>
    %279 = vector.extract_strided_slice %277 {offsets = [0, 64], sizes = [1, 64], strides = [1, 1]} : vector<1x128xf32> to vector<1x64xf32>
    %280 = vector.extract_strided_slice %269 {offsets = [0, 128], sizes = [1, 64], strides = [1, 1]} : vector<1x192xf32> to vector<1x64xf32>
    %281 = vector.extract_strided_slice %268 {offsets = [0, 128], sizes = [1, 64], strides = [1, 1]} : vector<1x192xf32> to vector<1x64xf32>
    %282 = arith.addf %281, %264 : vector<1x64xf32>
    %283 = arith.mulf %278, %282 : vector<1x64xf32>
    %284 = arith.addf %280, %283 : vector<1x64xf32>
    %285 = math.tanh %284 : vector<1x64xf32>
    %cst_69 = arith.constant 1.000000e+00 : f32
    %286 = vector.broadcast %cst_69 : f32 to vector<1x64xf32>
    %287 = arith.subf %286, %279 : vector<1x64xf32>
    %288 = arith.mulf %287, %285 : vector<1x64xf32>
    %289 = arith.mulf %279, %265 : vector<1x64xf32>
    %290 = arith.addf %288, %289 : vector<1x64xf32>
    %291 = arith.truncf %290 : vector<1x64xf32> to vector<1x64xbf16>
    %c0_70 = arith.constant 0 : index
    %c0_71 = arith.constant 0 : index
    %292 = vector.load %arg9[%c0_70, %c0_71] : memref<64x192xbf16, #tpu.memory_space<vmem>>, vector<64x192xbf16>
    %cst_72 = arith.constant dense<0.000000e+00> : vector<1x192xf32>
    %293 = tpu.matmul %291, %292, %cst_72 {dimension_numbers = #tpu.dot_dimension_numbers<[1], [0], [0], [1], [0, 0, 1, 1], [], []>} : vector<1x64xbf16>, vector<64x192xbf16>, vector<1x192xf32> -> vector<1x192xf32>
    %294 = vector.extract_strided_slice %263 {offsets = [1, 0], sizes = [1, 192], strides = [1, 1]} : vector<8x192xf32> to vector<1x192xf32>
    %295 = vector.extract_strided_slice %294 {offsets = [0, 0], sizes = [1, 128], strides = [1, 1]} : vector<1x192xf32> to vector<1x128xf32>
    %296 = vector.extract_strided_slice %293 {offsets = [0, 0], sizes = [1, 128], strides = [1, 1]} : vector<1x192xf32> to vector<1x128xf32>
    %297 = arith.addf %295, %296 : vector<1x128xf32>
    %298 = arith.negf %297 : vector<1x128xf32>
    %299 = math.exp %298 : vector<1x128xf32>
    %cst_73 = arith.constant 1.000000e+00 : f32
    %300 = vector.broadcast %cst_73 : f32 to vector<1x128xf32>
    %301 = arith.addf %300, %299 : vector<1x128xf32>
    %302 = arith.divf %300, %301 : vector<1x128xf32>
    %303 = vector.extract_strided_slice %302 {offsets = [0, 0], sizes = [1, 64], strides = [1, 1]} : vector<1x128xf32> to vector<1x64xf32>
    %304 = vector.extract_strided_slice %302 {offsets = [0, 64], sizes = [1, 64], strides = [1, 1]} : vector<1x128xf32> to vector<1x64xf32>
    %305 = vector.extract_strided_slice %294 {offsets = [0, 128], sizes = [1, 64], strides = [1, 1]} : vector<1x192xf32> to vector<1x64xf32>
    %306 = vector.extract_strided_slice %293 {offsets = [0, 128], sizes = [1, 64], strides = [1, 1]} : vector<1x192xf32> to vector<1x64xf32>
    %307 = arith.addf %306, %264 : vector<1x64xf32>
    %308 = arith.mulf %303, %307 : vector<1x64xf32>
    %309 = arith.addf %305, %308 : vector<1x64xf32>
    %310 = math.tanh %309 : vector<1x64xf32>
    %cst_74 = arith.constant 1.000000e+00 : f32
    %311 = vector.broadcast %cst_74 : f32 to vector<1x64xf32>
    %312 = arith.subf %311, %304 : vector<1x64xf32>
    %313 = arith.mulf %312, %310 : vector<1x64xf32>
    %314 = arith.mulf %304, %290 : vector<1x64xf32>
    %315 = arith.addf %313, %314 : vector<1x64xf32>
    %316 = arith.truncf %315 : vector<1x64xf32> to vector<1x64xbf16>
    %c0_75 = arith.constant 0 : index
    %c0_76 = arith.constant 0 : index
    %317 = vector.load %arg9[%c0_75, %c0_76] : memref<64x192xbf16, #tpu.memory_space<vmem>>, vector<64x192xbf16>
    %cst_77 = arith.constant dense<0.000000e+00> : vector<1x192xf32>
    %318 = tpu.matmul %316, %317, %cst_77 {dimension_numbers = #tpu.dot_dimension_numbers<[1], [0], [0], [1], [0, 0, 1, 1], [], []>} : vector<1x64xbf16>, vector<64x192xbf16>, vector<1x192xf32> -> vector<1x192xf32>
    %319 = vector.extract_strided_slice %263 {offsets = [2, 0], sizes = [1, 192], strides = [1, 1]} : vector<8x192xf32> to vector<1x192xf32>
    %320 = vector.extract_strided_slice %319 {offsets = [0, 0], sizes = [1, 128], strides = [1, 1]} : vector<1x192xf32> to vector<1x128xf32>
    %321 = vector.extract_strided_slice %318 {offsets = [0, 0], sizes = [1, 128], strides = [1, 1]} : vector<1x192xf32> to vector<1x128xf32>
    %322 = arith.addf %320, %321 : vector<1x128xf32>
    %323 = arith.negf %322 : vector<1x128xf32>
    %324 = math.exp %323 : vector<1x128xf32>
    %cst_78 = arith.constant 1.000000e+00 : f32
    %325 = vector.broadcast %cst_78 : f32 to vector<1x128xf32>
    %326 = arith.addf %325, %324 : vector<1x128xf32>
    %327 = arith.divf %325, %326 : vector<1x128xf32>
    %328 = vector.extract_strided_slice %327 {offsets = [0, 0], sizes = [1, 64], strides = [1, 1]} : vector<1x128xf32> to vector<1x64xf32>
    %329 = vector.extract_strided_slice %327 {offsets = [0, 64], sizes = [1, 64], strides = [1, 1]} : vector<1x128xf32> to vector<1x64xf32>
    %330 = vector.extract_strided_slice %319 {offsets = [0, 128], sizes = [1, 64], strides = [1, 1]} : vector<1x192xf32> to vector<1x64xf32>
    %331 = vector.extract_strided_slice %318 {offsets = [0, 128], sizes = [1, 64], strides = [1, 1]} : vector<1x192xf32> to vector<1x64xf32>
    %332 = arith.addf %331, %264 : vector<1x64xf32>
    %333 = arith.mulf %328, %332 : vector<1x64xf32>
    %334 = arith.addf %330, %333 : vector<1x64xf32>
    %335 = math.tanh %334 : vector<1x64xf32>
    %cst_79 = arith.constant 1.000000e+00 : f32
    %336 = vector.broadcast %cst_79 : f32 to vector<1x64xf32>
    %337 = arith.subf %336, %329 : vector<1x64xf32>
    %338 = arith.mulf %337, %335 : vector<1x64xf32>
    %339 = arith.mulf %329, %315 : vector<1x64xf32>
    %340 = arith.addf %338, %339 : vector<1x64xf32>
    %341 = arith.truncf %340 : vector<1x64xf32> to vector<1x64xbf16>
    %c0_80 = arith.constant 0 : index
    %c0_81 = arith.constant 0 : index
    %342 = vector.load %arg9[%c0_80, %c0_81] : memref<64x192xbf16, #tpu.memory_space<vmem>>, vector<64x192xbf16>
    %cst_82 = arith.constant dense<0.000000e+00> : vector<1x192xf32>
    %343 = tpu.matmul %341, %342, %cst_82 {dimension_numbers = #tpu.dot_dimension_numbers<[1], [0], [0], [1], [0, 0, 1, 1], [], []>} : vector<1x64xbf16>, vector<64x192xbf16>, vector<1x192xf32> -> vector<1x192xf32>
    %344 = vector.extract_strided_slice %263 {offsets = [3, 0], sizes = [1, 192], strides = [1, 1]} : vector<8x192xf32> to vector<1x192xf32>
    %345 = vector.extract_strided_slice %344 {offsets = [0, 0], sizes = [1, 128], strides = [1, 1]} : vector<1x192xf32> to vector<1x128xf32>
    %346 = vector.extract_strided_slice %343 {offsets = [0, 0], sizes = [1, 128], strides = [1, 1]} : vector<1x192xf32> to vector<1x128xf32>
    %347 = arith.addf %345, %346 : vector<1x128xf32>
    %348 = arith.negf %347 : vector<1x128xf32>
    %349 = math.exp %348 : vector<1x128xf32>
    %cst_83 = arith.constant 1.000000e+00 : f32
    %350 = vector.broadcast %cst_83 : f32 to vector<1x128xf32>
    %351 = arith.addf %350, %349 : vector<1x128xf32>
    %352 = arith.divf %350, %351 : vector<1x128xf32>
    %353 = vector.extract_strided_slice %352 {offsets = [0, 0], sizes = [1, 64], strides = [1, 1]} : vector<1x128xf32> to vector<1x64xf32>
    %354 = vector.extract_strided_slice %352 {offsets = [0, 64], sizes = [1, 64], strides = [1, 1]} : vector<1x128xf32> to vector<1x64xf32>
    %355 = vector.extract_strided_slice %344 {offsets = [0, 128], sizes = [1, 64], strides = [1, 1]} : vector<1x192xf32> to vector<1x64xf32>
    %356 = vector.extract_strided_slice %343 {offsets = [0, 128], sizes = [1, 64], strides = [1, 1]} : vector<1x192xf32> to vector<1x64xf32>
    %357 = arith.addf %356, %264 : vector<1x64xf32>
    %358 = arith.mulf %353, %357 : vector<1x64xf32>
    %359 = arith.addf %355, %358 : vector<1x64xf32>
    %360 = math.tanh %359 : vector<1x64xf32>
    %cst_84 = arith.constant 1.000000e+00 : f32
    %361 = vector.broadcast %cst_84 : f32 to vector<1x64xf32>
    %362 = arith.subf %361, %354 : vector<1x64xf32>
    %363 = arith.mulf %362, %360 : vector<1x64xf32>
    %364 = arith.mulf %354, %340 : vector<1x64xf32>
    %365 = arith.addf %363, %364 : vector<1x64xf32>
    %366 = arith.truncf %365 : vector<1x64xf32> to vector<1x64xbf16>
    %c0_85 = arith.constant 0 : index
    %c0_86 = arith.constant 0 : index
    %367 = vector.load %arg9[%c0_85, %c0_86] : memref<64x192xbf16, #tpu.memory_space<vmem>>, vector<64x192xbf16>
    %cst_87 = arith.constant dense<0.000000e+00> : vector<1x192xf32>
    %368 = tpu.matmul %366, %367, %cst_87 {dimension_numbers = #tpu.dot_dimension_numbers<[1], [0], [0], [1], [0, 0, 1, 1], [], []>} : vector<1x64xbf16>, vector<64x192xbf16>, vector<1x192xf32> -> vector<1x192xf32>
    %369 = vector.extract_strided_slice %263 {offsets = [4, 0], sizes = [1, 192], strides = [1, 1]} : vector<8x192xf32> to vector<1x192xf32>
    %370 = vector.extract_strided_slice %369 {offsets = [0, 0], sizes = [1, 128], strides = [1, 1]} : vector<1x192xf32> to vector<1x128xf32>
    %371 = vector.extract_strided_slice %368 {offsets = [0, 0], sizes = [1, 128], strides = [1, 1]} : vector<1x192xf32> to vector<1x128xf32>
    %372 = arith.addf %370, %371 : vector<1x128xf32>
    %373 = arith.negf %372 : vector<1x128xf32>
    %374 = math.exp %373 : vector<1x128xf32>
    %cst_88 = arith.constant 1.000000e+00 : f32
    %375 = vector.broadcast %cst_88 : f32 to vector<1x128xf32>
    %376 = arith.addf %375, %374 : vector<1x128xf32>
    %377 = arith.divf %375, %376 : vector<1x128xf32>
    %378 = vector.extract_strided_slice %377 {offsets = [0, 0], sizes = [1, 64], strides = [1, 1]} : vector<1x128xf32> to vector<1x64xf32>
    %379 = vector.extract_strided_slice %377 {offsets = [0, 64], sizes = [1, 64], strides = [1, 1]} : vector<1x128xf32> to vector<1x64xf32>
    %380 = vector.extract_strided_slice %369 {offsets = [0, 128], sizes = [1, 64], strides = [1, 1]} : vector<1x192xf32> to vector<1x64xf32>
    %381 = vector.extract_strided_slice %368 {offsets = [0, 128], sizes = [1, 64], strides = [1, 1]} : vector<1x192xf32> to vector<1x64xf32>
    %382 = arith.addf %381, %264 : vector<1x64xf32>
    %383 = arith.mulf %378, %382 : vector<1x64xf32>
    %384 = arith.addf %380, %383 : vector<1x64xf32>
    %385 = math.tanh %384 : vector<1x64xf32>
    %cst_89 = arith.constant 1.000000e+00 : f32
    %386 = vector.broadcast %cst_89 : f32 to vector<1x64xf32>
    %387 = arith.subf %386, %379 : vector<1x64xf32>
    %388 = arith.mulf %387, %385 : vector<1x64xf32>
    %389 = arith.mulf %379, %365 : vector<1x64xf32>
    %390 = arith.addf %388, %389 : vector<1x64xf32>
    %391 = arith.truncf %390 : vector<1x64xf32> to vector<1x64xbf16>
    %c0_90 = arith.constant 0 : index
    %c0_91 = arith.constant 0 : index
    %392 = vector.load %arg9[%c0_90, %c0_91] : memref<64x192xbf16, #tpu.memory_space<vmem>>, vector<64x192xbf16>
    %cst_92 = arith.constant dense<0.000000e+00> : vector<1x192xf32>
    %393 = tpu.matmul %391, %392, %cst_92 {dimension_numbers = #tpu.dot_dimension_numbers<[1], [0], [0], [1], [0, 0, 1, 1], [], []>} : vector<1x64xbf16>, vector<64x192xbf16>, vector<1x192xf32> -> vector<1x192xf32>
    %394 = vector.extract_strided_slice %263 {offsets = [5, 0], sizes = [1, 192], strides = [1, 1]} : vector<8x192xf32> to vector<1x192xf32>
    %395 = vector.extract_strided_slice %394 {offsets = [0, 0], sizes = [1, 128], strides = [1, 1]} : vector<1x192xf32> to vector<1x128xf32>
    %396 = vector.extract_strided_slice %393 {offsets = [0, 0], sizes = [1, 128], strides = [1, 1]} : vector<1x192xf32> to vector<1x128xf32>
    %397 = arith.addf %395, %396 : vector<1x128xf32>
    %398 = arith.negf %397 : vector<1x128xf32>
    %399 = math.exp %398 : vector<1x128xf32>
    %cst_93 = arith.constant 1.000000e+00 : f32
    %400 = vector.broadcast %cst_93 : f32 to vector<1x128xf32>
    %401 = arith.addf %400, %399 : vector<1x128xf32>
    %402 = arith.divf %400, %401 : vector<1x128xf32>
    %403 = vector.extract_strided_slice %402 {offsets = [0, 0], sizes = [1, 64], strides = [1, 1]} : vector<1x128xf32> to vector<1x64xf32>
    %404 = vector.extract_strided_slice %402 {offsets = [0, 64], sizes = [1, 64], strides = [1, 1]} : vector<1x128xf32> to vector<1x64xf32>
    %405 = vector.extract_strided_slice %394 {offsets = [0, 128], sizes = [1, 64], strides = [1, 1]} : vector<1x192xf32> to vector<1x64xf32>
    %406 = vector.extract_strided_slice %393 {offsets = [0, 128], sizes = [1, 64], strides = [1, 1]} : vector<1x192xf32> to vector<1x64xf32>
    %407 = arith.addf %406, %264 : vector<1x64xf32>
    %408 = arith.mulf %403, %407 : vector<1x64xf32>
    %409 = arith.addf %405, %408 : vector<1x64xf32>
    %410 = math.tanh %409 : vector<1x64xf32>
    %cst_94 = arith.constant 1.000000e+00 : f32
    %411 = vector.broadcast %cst_94 : f32 to vector<1x64xf32>
    %412 = arith.subf %411, %404 : vector<1x64xf32>
    %413 = arith.mulf %412, %410 : vector<1x64xf32>
    %414 = arith.mulf %404, %390 : vector<1x64xf32>
    %415 = arith.addf %413, %414 : vector<1x64xf32>
    %416 = arith.truncf %415 : vector<1x64xf32> to vector<1x64xbf16>
    %c0_95 = arith.constant 0 : index
    %c0_96 = arith.constant 0 : index
    %417 = vector.load %arg9[%c0_95, %c0_96] : memref<64x192xbf16, #tpu.memory_space<vmem>>, vector<64x192xbf16>
    %cst_97 = arith.constant dense<0.000000e+00> : vector<1x192xf32>
    %418 = tpu.matmul %416, %417, %cst_97 {dimension_numbers = #tpu.dot_dimension_numbers<[1], [0], [0], [1], [0, 0, 1, 1], [], []>} : vector<1x64xbf16>, vector<64x192xbf16>, vector<1x192xf32> -> vector<1x192xf32>
    %419 = vector.extract_strided_slice %263 {offsets = [6, 0], sizes = [1, 192], strides = [1, 1]} : vector<8x192xf32> to vector<1x192xf32>
    %420 = vector.extract_strided_slice %419 {offsets = [0, 0], sizes = [1, 128], strides = [1, 1]} : vector<1x192xf32> to vector<1x128xf32>
    %421 = vector.extract_strided_slice %418 {offsets = [0, 0], sizes = [1, 128], strides = [1, 1]} : vector<1x192xf32> to vector<1x128xf32>
    %422 = arith.addf %420, %421 : vector<1x128xf32>
    %423 = arith.negf %422 : vector<1x128xf32>
    %424 = math.exp %423 : vector<1x128xf32>
    %cst_98 = arith.constant 1.000000e+00 : f32
    %425 = vector.broadcast %cst_98 : f32 to vector<1x128xf32>
    %426 = arith.addf %425, %424 : vector<1x128xf32>
    %427 = arith.divf %425, %426 : vector<1x128xf32>
    %428 = vector.extract_strided_slice %427 {offsets = [0, 0], sizes = [1, 64], strides = [1, 1]} : vector<1x128xf32> to vector<1x64xf32>
    %429 = vector.extract_strided_slice %427 {offsets = [0, 64], sizes = [1, 64], strides = [1, 1]} : vector<1x128xf32> to vector<1x64xf32>
    %430 = vector.extract_strided_slice %419 {offsets = [0, 128], sizes = [1, 64], strides = [1, 1]} : vector<1x192xf32> to vector<1x64xf32>
    %431 = vector.extract_strided_slice %418 {offsets = [0, 128], sizes = [1, 64], strides = [1, 1]} : vector<1x192xf32> to vector<1x64xf32>
    %432 = arith.addf %431, %264 : vector<1x64xf32>
    %433 = arith.mulf %428, %432 : vector<1x64xf32>
    %434 = arith.addf %430, %433 : vector<1x64xf32>
    %435 = math.tanh %434 : vector<1x64xf32>
    %cst_99 = arith.constant 1.000000e+00 : f32
    %436 = vector.broadcast %cst_99 : f32 to vector<1x64xf32>
    %437 = arith.subf %436, %429 : vector<1x64xf32>
    %438 = arith.mulf %437, %435 : vector<1x64xf32>
    %439 = arith.mulf %429, %415 : vector<1x64xf32>
    %440 = arith.addf %438, %439 : vector<1x64xf32>
    %441 = arith.truncf %440 : vector<1x64xf32> to vector<1x64xbf16>
    %c0_100 = arith.constant 0 : index
    %c0_101 = arith.constant 0 : index
    %442 = vector.load %arg9[%c0_100, %c0_101] : memref<64x192xbf16, #tpu.memory_space<vmem>>, vector<64x192xbf16>
    %cst_102 = arith.constant dense<0.000000e+00> : vector<1x192xf32>
    %443 = tpu.matmul %441, %442, %cst_102 {dimension_numbers = #tpu.dot_dimension_numbers<[1], [0], [0], [1], [0, 0, 1, 1], [], []>} : vector<1x64xbf16>, vector<64x192xbf16>, vector<1x192xf32> -> vector<1x192xf32>
    %444 = vector.extract_strided_slice %263 {offsets = [7, 0], sizes = [1, 192], strides = [1, 1]} : vector<8x192xf32> to vector<1x192xf32>
    %445 = vector.extract_strided_slice %444 {offsets = [0, 0], sizes = [1, 128], strides = [1, 1]} : vector<1x192xf32> to vector<1x128xf32>
    %446 = vector.extract_strided_slice %443 {offsets = [0, 0], sizes = [1, 128], strides = [1, 1]} : vector<1x192xf32> to vector<1x128xf32>
    %447 = arith.addf %445, %446 : vector<1x128xf32>
    %448 = arith.negf %447 : vector<1x128xf32>
    %449 = math.exp %448 : vector<1x128xf32>
    %cst_103 = arith.constant 1.000000e+00 : f32
    %450 = vector.broadcast %cst_103 : f32 to vector<1x128xf32>
    %451 = arith.addf %450, %449 : vector<1x128xf32>
    %452 = arith.divf %450, %451 : vector<1x128xf32>
    %453 = vector.extract_strided_slice %452 {offsets = [0, 0], sizes = [1, 64], strides = [1, 1]} : vector<1x128xf32> to vector<1x64xf32>
    %454 = vector.extract_strided_slice %452 {offsets = [0, 64], sizes = [1, 64], strides = [1, 1]} : vector<1x128xf32> to vector<1x64xf32>
    %455 = vector.extract_strided_slice %444 {offsets = [0, 128], sizes = [1, 64], strides = [1, 1]} : vector<1x192xf32> to vector<1x64xf32>
    %456 = vector.extract_strided_slice %443 {offsets = [0, 128], sizes = [1, 64], strides = [1, 1]} : vector<1x192xf32> to vector<1x64xf32>
    %457 = arith.addf %456, %264 : vector<1x64xf32>
    %458 = arith.mulf %453, %457 : vector<1x64xf32>
    %459 = arith.addf %455, %458 : vector<1x64xf32>
    %460 = math.tanh %459 : vector<1x64xf32>
    %cst_104 = arith.constant 1.000000e+00 : f32
    %461 = vector.broadcast %cst_104 : f32 to vector<1x64xf32>
    %462 = arith.subf %461, %454 : vector<1x64xf32>
    %463 = arith.mulf %462, %460 : vector<1x64xf32>
    %464 = arith.mulf %454, %440 : vector<1x64xf32>
    %465 = arith.addf %463, %464 : vector<1x64xf32>
    %466 = vector.extract_strided_slice %290 {offsets = [0, 0], sizes = [1, 32], strides = [1, 1]} : vector<1x64xf32> to vector<1x32xf32>
    %467 = vector.extract_strided_slice %315 {offsets = [0, 0], sizes = [1, 32], strides = [1, 1]} : vector<1x64xf32> to vector<1x32xf32>
    %468 = vector.extract_strided_slice %340 {offsets = [0, 0], sizes = [1, 32], strides = [1, 1]} : vector<1x64xf32> to vector<1x32xf32>
    %469 = vector.extract_strided_slice %365 {offsets = [0, 0], sizes = [1, 32], strides = [1, 1]} : vector<1x64xf32> to vector<1x32xf32>
    %470 = vector.extract_strided_slice %390 {offsets = [0, 0], sizes = [1, 32], strides = [1, 1]} : vector<1x64xf32> to vector<1x32xf32>
    %471 = vector.extract_strided_slice %415 {offsets = [0, 0], sizes = [1, 32], strides = [1, 1]} : vector<1x64xf32> to vector<1x32xf32>
    %472 = vector.extract_strided_slice %440 {offsets = [0, 0], sizes = [1, 32], strides = [1, 1]} : vector<1x64xf32> to vector<1x32xf32>
    %473 = vector.extract_strided_slice %465 {offsets = [0, 0], sizes = [1, 32], strides = [1, 1]} : vector<1x64xf32> to vector<1x32xf32>
    %474 = vector.extract_strided_slice %465 {offsets = [0, 32], sizes = [1, 32], strides = [1, 1]} : vector<1x64xf32> to vector<1x32xf32>
    %475 = vector.extract_strided_slice %440 {offsets = [0, 32], sizes = [1, 32], strides = [1, 1]} : vector<1x64xf32> to vector<1x32xf32>
    %476 = vector.extract_strided_slice %415 {offsets = [0, 32], sizes = [1, 32], strides = [1, 1]} : vector<1x64xf32> to vector<1x32xf32>
    %477 = vector.extract_strided_slice %390 {offsets = [0, 32], sizes = [1, 32], strides = [1, 1]} : vector<1x64xf32> to vector<1x32xf32>
    %478 = vector.extract_strided_slice %365 {offsets = [0, 32], sizes = [1, 32], strides = [1, 1]} : vector<1x64xf32> to vector<1x32xf32>
    %479 = vector.extract_strided_slice %340 {offsets = [0, 32], sizes = [1, 32], strides = [1, 1]} : vector<1x64xf32> to vector<1x32xf32>
    %480 = vector.extract_strided_slice %315 {offsets = [0, 32], sizes = [1, 32], strides = [1, 1]} : vector<1x64xf32> to vector<1x32xf32>
    %481 = vector.extract_strided_slice %290 {offsets = [0, 32], sizes = [1, 32], strides = [1, 1]} : vector<1x64xf32> to vector<1x32xf32>
    %482 = tpu.concatenate %466, %467, %468, %469, %470, %471, %472, %473 in 0 : vector<1x32xf32>, vector<1x32xf32>, vector<1x32xf32>, vector<1x32xf32>, vector<1x32xf32>, vector<1x32xf32>, vector<1x32xf32>, vector<1x32xf32> -> vector<8x32xf32>
    %483 = tpu.concatenate %474, %475, %476, %477, %478, %479, %480, %481 in 0 : vector<1x32xf32>, vector<1x32xf32>, vector<1x32xf32>, vector<1x32xf32>, vector<1x32xf32>, vector<1x32xf32>, vector<1x32xf32>, vector<1x32xf32> -> vector<8x32xf32>
    %484 = tpu.concatenate %482, %483 in 1 : vector<8x32xf32>, vector<8x32xf32> -> vector<8x64xf32>
    %c0_105 = arith.constant 0 : index
    %c0_106 = arith.constant 0 : index
    %485 = vector.load %arg11[%c0_105, %c0_106] : memref<8x64xf32, #tpu.memory_space<vmem>>, vector<8x64xf32>
    tpu.vector_store %arg11[%c0_105, %c0_106], %484 {strides = array<i32>} : memref<8x64xf32, #tpu.memory_space<vmem>>, vector<8x64xf32>,
    %486 = tpu.concatenate %234, %465 in 0 : vector<1x64xf32>, vector<1x64xf32> -> vector<2x64xf32>
    %c0_107 = arith.constant 0 : index
    %c0_108 = arith.constant 0 : index
    %487 = vector.load %arg12[%c0_107, %c0_108] : memref<2x64xf32, #tpu.memory_space<vmem>>, vector<2x64xf32>
    tpu.vector_store %arg12[%c0_107, %c0_108], %486 {strides = array<i32>} : memref<2x64xf32, #tpu.memory_space<vmem>>, vector<2x64xf32>,
    return
  }
}

</mosaic_0001>

<bundles_post_ra>
// kernel: tpu_custom_call.1
= control target key start
LH: loop header
LB: loop body
LE: loop exit
PB: predicated region body
PF: predicated region fallthrough
CT: control target
= control target key end

     0   :  { %18 = vsyncpa [#allocation4], 0  ;;  %s2877_s0 = inlined_call_operand.vmem [shape: s32[8], index: 0, kind: input, shape index: {}]   ;;  %s2878_s1 = inlined_call_operand.vmem [shape: f32[64,32], index: 1, kind: input, shape index: {}]   ;;  %s2879_s2 = inlined_call_operand.vmem [shape: f32[2,64], index: 2, kind: input, shape index: {}]   ;;  %s2880_s3 = inlined_call_operand.vmem [shape: bf16[64,192], index: 3, kind: input, shape index: {}]   ;;  %s2881_s4 = inlined_call_operand.vmem [shape: f32[1,192], index: 4, kind: input, shape index: {}]   ;;  %s2882_s5 = inlined_call_operand.vmem [shape: bf16[64,192], index: 5, kind: input, shape index: {}]   ;;  %s2883_s6 = inlined_call_operand.vmem [shape: f32[1,64], index: 6, kind: input, shape index: {}]   ;;  %s2884_s7 = inlined_call_operand.vmem [shape: bf16[128,192], index: 7, kind: input, shape index: {}]   ;;  %s2885_s8 = inlined_call_operand.vmem [shape: f32[1,192], index: 8, kind: input, shape index: {}]   ;;  %s2886_s9 = inlined_call_operand.vmem [shape: bf16[64,192], index: 9, kind: input, shape index: {}]   ;;  %s2887_s10 = inlined_call_operand.vmem [shape: f32[1,64], index: 10, kind: input, shape index: {}]   ;;  %s2888_s11 = inlined_call_operand.hbm [shape: f32[8,64], index: 11, kind: output, shape index: {0}]   ;;  %s2889_s12 = inlined_call_operand.hbm [shape: f32[2,64], index: 12, kind: output, shape index: {1}]  }
   0x1   :  { %19 = vsyncpa [#allocation3], 0 }
   0x2   :  { %20 = vsyncpa [#allocation7], 0  ;;  %s27_s23 = sshll.u32 %s2877_s0, 4  ;;  %s28_s23 = int_to_ptr.vmem [resolvable:$true] %s27_s23 }
   0x3   :  { %s2097_s24 = scalar_lea.vmem %s28_s23, 16  ;;  %p2102_p1 = scmp.lt.s32.totalorder %s28_s23, %s28_s23 }
   0x4   :  { %p2098_p0 = scmp.ne.s32.totalorder %s28_s23, %s2097_s24  ;;  %p2103_p2 = scmp.lt.s32.totalorder %s2097_s24, %s2097_s24 }
   0x6   :  { %p2104_p3 = por %p2103_p2, %p2102_p1 }
   0x8   :  { %p2105_p4 = pnand %p2104_p3, %p2098_p0 }
   0xa   :  { %2108 = shalt.err (!%p2105_p4)
}
   0xb   :  { %s2155_s25 = smov [#allocation2]  }
   0xc   :  { %30 = dma.vmem_to_smem %s28_s23, 16, %s2155_s25, [#allocation4]  }
   0xd   :  { %2149 = dma.done.wait [#allocation4], 16  }
   0xe   :  { %2150 = vsyncadd [#allocation4], 4294967280 }
   0xf   :  { %54 = sfence }
  0x10   :  { %s56_s26 = sld [smem:[#allocation2]]  ;;  %vm101_vm0 = vcmask 1040384   ;;  %v2232_v0 = vld [vmem:[%s2882_s5 + $0x34] ss:$8 sps:$4 sm:$0xff]   ;;  %v2239_v1 = vld [vmem:[%s2882_s5 + $0x30] ss:$8 sps:$4 sm:$0xff]   ;;  %v154_v62 = vlaneseq }
  0x11   :  { %s1850_s27 = sld [smem:[#allocation2 + $0x1]]  ;;  %311 = vmatprep.subr.bf16.mxu1 %v2232_v0  ;;  %v1944_v2 = vld [vmem:[%s2880_s3 + $0x34] ss:$8 sps:$4 sm:$0xff]   ;;  %v2253_v3 = vld [vmem:[%s2882_s5 + $0x24] ss:$8 sps:$4 sm:$0xff]   ;;  %vm103_vm1 = vcmask 1041408  }
  0x12   :  { %s1851_s28 = sld [smem:[#allocation2 + $0x2]]  ;;  %312 = vmatpush1.bf16.msra.mxu1 %v2239_v1  ;;  %v1948_v4 = vld [vmem:[%s2880_s3 + $0x30] ss:$8 sps:$4 sm:$0xff]   ;;  %216 = vmatprep.subr.bf16.mxu0 %v1944_v2  ;;  %v2266_v5 = vld [vmem:[%s2882_s5 + $0x20] ss:$8 sps:$4 sm:$0xff]   ;;  %vm105_vm2 = vcmask 1042432  }
  0x13   :  { %s2234_s0 = sld [smem:[#allocation2 + $0x3]]  ;;  %313 = vmatprep.subr.bf16.mxu1 %v2253_v3  ;;  %217 = vmatpush1.bf16.msra.mxu0 %v1948_v4  ;;  %v1950_v6 = vld [vmem:[%s2880_s3 + $0x24] ss:$8 sps:$4 sm:$0xff]   ;;  %vm107_vm3 = vcmask 1043456   ;;  %vm109_vm4 = vcmask 1044480   ;;  %v2156_v17 = vmov 0  }
  0x14   :  { %s2241_s15 = sld [smem:[#allocation2 + $0x4]]  ;;  %218 = vmatprep.subr.bf16.mxu0 %v1950_v6  ;;  %v2296_v12 = vld [vmem:[%s2882_s5 + $0x14] ss:$8 sps:$4 sm:$0xff]   ;;  %v1954_v16 = vld [vmem:[%s2880_s3 + $0x20] ss:$8 sps:$4 sm:$0xff]   ;;  %335 = vmatprep.mubr.bf16.mxu1 %v2156_v17  ;;  %vm204_vm5 = vcmask 523264  }
  0x15   :  { %s2247_s18 = sld [smem:[#allocation2 + $0x5]]  ;;  %240 = vmatprep.mubr.bf16.mxu0 %v2156_v17  ;;  %v2319_v22 = vld [vmem:[%s2882_s5 + $0x10] ss:$8 sps:$4 sm:$0xff]   ;;  %v1956_v29 = vld [vmem:[%s2880_s3 + $0x14] ss:$8 sps:$4 sm:$0xff]   ;;  %vm111_vm6 = vcmask 1045504  }
  0x16   :  { %s57_s25 = scalar_lea.vmem %s2878_s1, %s56_s26  ;;  %s2261_s29 = sld [smem:[#allocation2 + $0x6]]  ;;  %314 = vmatpush1.bf16.msra.mxu1 %v2266_v5  ;;  %v2338_v32 = vld [vmem:[%s2882_s5 + $0x4] ss:$8 sps:$4 sm:$0xff]   ;;  %v1960_v33 = vld [vmem:[%s2880_s3 + $0x10] ss:$8 sps:$4 sm:$0xff]   ;;  %vm113_vm7 = vcmask 1046528  }
  0x17   :  { %s60_s17 = scalar_lea.vmem %s2878_s1, %s1850_s27  ;;  %s2271_s19 = sld [smem:[#allocation2 + $0x7]]  ;;  %v2277_v7 = vld [vmem:[%s57_s25] sm:$0x1]  ;;  %315 = vmatprep.subr.bf16.mxu1 %v2296_v12  ;;  %219 = vmatpush1.bf16.msra.mxu0 %v1954_v16  ;;  %v1962_v37 = vld [vmem:[%s2880_s3 + $0x4] ss:$8 sps:$4 sm:$0xff]   ;;  %vm141_vm8 = vcmask 261120  }
  0x18   :  { %v2279_v8 = vld [vmem:[%s60_s17] sm:$0x1]  ;;  %s63_s27 = scalar_lea.vmem %s2878_s1, %s1851_s28  ;;  %220 = vmatprep.subr.bf16.mxu0 %v1956_v29  ;;  %v128_v45 = vrot.slane %v2277_v7, 1  ;;  %s2157_s22 = smov 64   ;;  %v2397_v63 = vshrl.u32 %v154_v62, 7  ;;  %vm1811_vm9 = vcmask 517120  }
  0x19   :  { %v2284_v9 = vld [vmem:[%s63_s27] sm:$0x1]  ;;  %s66_s30 = scalar_lea.vmem %s2878_s1, %s2234_s0  ;;  %v81_v10 = vrot.slane %v2279_v8, 7  ;;  %v125_v11 = vrot.slane %v2279_v8, 2  ;;  %s2160_s28 = smov [#allocation5]  }
  0x1a   :  { %v67_v13 = vld [vmem:[%s66_s30] sm:$0x1]  ;;  %s69_s0 = scalar_lea.vmem %s2878_s1, %s2241_s15  ;;  %v84_v14 = vrot.slane %v2284_v9, 6  ;;  %v123_v15 = vrot.slane %v2284_v9, 3  ;;  %316 = vmatpush1.bf16.msra.mxu1 %v2319_v22  ;;  %v156_v2 = vsub.s32 0, %v2397_v63 }
  0x1b   :  { %v70_v18 = vld [vmem:[%s69_s0] sm:$0x1]  ;;  %s72_s21 = scalar_lea.vmem %s2878_s1, %s2247_s18  ;;  %v87_v19 = vrot.slane %v67_v13, 5  ;;  %v121_v20 = vrot.slane %v67_v13, 4  ;;  %v102_v21 = vsel %vm101_vm0, %v2277_v7, %v81_v10  ;;  %317 = vmatprep.subr.bf16.mxu1 %v2338_v32  ;;  %221 = vmatpush1.bf16.msra.mxu0 %v1960_v33 }
  0x1c   :  { %v73_v23 = vld [vmem:[%s72_s21] sm:$0x1]  ;;  %s75_s24 = scalar_lea.vmem %s2878_s1, %s2261_s29  ;;  %v119_v24 = vrot.slane %v70_v18, 5  ;;  %v104_v25 = vsel %vm103_vm1, %v102_v21, %v84_v14  ;;  %v90_v35 = vrot.slane %v70_v18, 4  ;;  %222 = vmatprep.subr.bf16.mxu0 %v1962_v37  ;;  %v160_v18 = vsub.s32 1, %v2397_v63  ;;  %s1819_s29 = sshll.u32 %s2160_s28, 4  ;;  %s1820_s29 = int_to_ptr.vmem [resolvable:$true] %s1819_s29 }
  0x1d   :  { %v76_v26 = vld [vmem:[%s75_s24] sm:$0x1]  ;;  %s78_s25 = scalar_lea.vmem %s2878_s1, %s2271_s19  ;;  %v117_v27 = vrot.slane %v73_v23, 6  ;;  %v106_v28 = vsel %vm105_vm2, %v104_v25, %v87_v19  ;;  %v93_v39 = vrot.slane %v73_v23, 3 }
  0x1e   :  { %v79_v30 = vld [vmem:[%s78_s25] sm:$0x1]  ;;  %v115_v31 = vrot.slane %v76_v26, 7  ;;  %v96_v42 = vrot.slane %v76_v26, 2  ;;  %v108_v47 = vsel %vm107_vm3, %v106_v28, %v90_v35 }
  0x1f   :  { %v2346_v34 = vld [vmem:[%s2882_s5] ss:$8 sps:$4 sm:$0xff]   ;;  %v99_v43 = vrot.slane %v79_v30, 1  ;;  %v110_v49 = vsel %vm109_vm4, %v108_v47, %v93_v39 }
  0x20   :  { %v130_v36 = vsel %vm101_vm0, %v79_v30, %v115_v31  ;;  %v250_v38 = vld [vmem:[%s2879_s2] sm:$0x1]  ;;  %318 = vmatpush1.bf16.msra.mxu1 %v2346_v34  ;;  %v112_v51 = vsel %vm111_vm6, %v110_v49, %v96_v42 }
  0x21   :  { %v131_v40 = vsel %vm103_vm1, %v130_v36, %v117_v27  ;;  %v251_v41 = vpack.c.bf16 %v250_v38, %v250_v38  ;;  %v1964_v44 = vld [vmem:[%s2880_s3] ss:$8 sps:$4 sm:$0xff]   ;;  %362 = vrot.lane.b32.xlu1 %v250_v38, %s2157_s22  ;;  %460 = vmatprep.subr.bf16.mxu1 %v2232_v0  ;;  %v114_v53 = vsel %vm113_vm7, %v112_v51, %v99_v43  ;;  %s2158_s3 = smov 32  }
  0x22   :  { %v132_v46 = vsel %vm105_vm2, %v131_v40, %v119_v24  ;;  %223 = vmatpush1.bf16.msra.mxu0 %v1964_v44  ;;  %v152_v4 = vld [vmem:[%s2881_s4] sm:$0x3] }
  0x23   :  { %v133_v48 = vsel %vm107_vm3, %v132_v46, %v121_v20  ;;  %1874 = vmatmul.mubr.msk.bf16.vlgmr.msra.gmra.mxu1 %vm204_vm5, %v251_v41  ;;  %382 = vmatprep.subr.bf16.mxu0 %v2232_v0  ;;  %v157_v6 = vrot.slane %v152_v4, %v156_v2  ;;  %v2412_v19 = vld [vmem:[%s2883_s6] sm:$0x1]  ;;  %v161_v20 = vrot.slane %v152_v4, %v160_v18 }
  0x24   :  { %v134_v50 = vsel %vm109_vm4, %v133_v48, %v123_v15  ;;  %461 = vmatpush1.bf16.msra.mxu1 %v2239_v1  ;;  %484 = vmatprep.mubr.bf16.mxu1 %v2156_v17 }
  0x25   :  { %v135_v52 = vsel %vm111_vm6, %v134_v50, %v125_v11  ;;  %462 = vmatprep.subr.bf16.mxu1 %v2253_v3 }
  0x26   :  { %v136_v54 = vsel %vm113_vm7, %v135_v52, %v128_v45 }
  0x27   :  { %138 = vrot.lane.b32.xlu0 %v136_v54, %s2158_s3 }
  0x28   :  { %463 = vmatpush1.bf16.msra.mxu1 %v2266_v5 }
  0x29   :  { %464 = vmatprep.subr.bf16.mxu1 %v2296_v12 }
  0x2c   :  { %465 = vmatpush1.bf16.msra.mxu1 %v2319_v22 }
  0x2d   :  { %466 = vmatprep.subr.bf16.mxu1 %v2338_v32 }
  0x30   :  { %467 = vmatpush1.bf16.msra.mxu1 %v2346_v34 }
  0x31   :  { %616 = vmatprep.subr.bf16.mxu1 %v2232_v0 }
  0x93   :  { %v363_v28 = vpop.permute.xlu1 %362 }
  0x99   :  { %v139_v55 = vpop.permute.xlu0 %138 }
  0x9a   :  { %v142_v56 = vsel %vm141_vm8, %v114_v53, %v139_v55 }
  0x9b   :  { %v143_v57 = vpack.c.bf16 %v142_v56, %v142_v56 }
  0x9d   :  { %1865 = vmatmul.mubr.msk.bf16.vlgmr.msra.gmra.mxu0 %vm204_vm5, %v143_v57 }
  0x9e   :  { %383 = vmatpush1.bf16.msra.mxu0 %v2239_v1  ;;  %406 = vmatprep.mubr.bf16.mxu0 %v2156_v17 }
  0x9f   :  { %384 = vmatprep.subr.bf16.mxu0 %v2253_v3 }
  0xa2   :  { %385 = vmatpush1.bf16.msra.mxu0 %v2266_v5 }
  0xa3   :  { %386 = vmatprep.subr.bf16.mxu0 %v2296_v12 }
  0xa6   :  { %387 = vmatpush1.bf16.msra.mxu0 %v2319_v22 }
  0xa7   :  { %388 = vmatprep.subr.bf16.mxu0 %v2338_v32 }
  0xaa   :  { %389 = vmatpush1.bf16.msra.mxu0 %v2346_v34 }
  0xab   :  { %537 = vmatprep.subr.bf16.mxu0 %v2232_v0 }
  0xe3   :  { %v337_v58 = vpop.f32.mrf.mxu1 }
  0xe5   :  { %v339_v59 = vpop.f32.mrf.mxu1 }
  0xe6   :  { %v351_v21 = vadd.f32 %v339_v59, %v2412_v19 }
  0xe7   :  { %v341_v60 = vpop.f32.mrf.mxu1 }
  0xe9   :  { %v342_v61 = vpop.f32.mrf.mxu1 }
 0x15d   :  { %v242_v7 = vpop.f32.mrf.mxu0 }
 0x15e   :  { %v2405_v8 = vadd.f32 %v242_v7, %v157_v6 }
 0x15f   :  { %v244_v9 = vpop.f32.mrf.mxu0 }
 0x160   :  { %v344_v10 = vadd.f32 %v337_v58, %v2405_v8  ;;  %v2417_v24 = vadd.f32 %v244_v9, %v161_v20 }
 0x161   :  { %v246_v11 = vpop.f32.mrf.mxu0 }
 0x162   :  { %v1875_v13 = vmul.f32 -1.442695, %v344_v10 }
 0x163   :  { %v247_v14 = vpop.f32.mrf.mxu0 }
 0x164   :  { %2001 = vpow2.f32 %v1875_v13 }
 0x171   :  { %v2002_v15 = vpop.eup %2001 }
 0x172   :  { %v348_v16 = vadd.f32 1.0, %v2002_v15 }
 0x174   :  { %2003 = vrcp.f32 %v348_v16 }
 0x181   :  { %v2004_v23 = vpop.eup %2003 }
 0x182   :  { %v352_v25 = vmul.f32 %v2004_v23, %v351_v21  ;;  %v355_v29 = vsub.f32 1.0, %v2004_v23  ;;  %v365_v31 = vmul.f32 %v2004_v23, %v363_v28 }
 0x184   :  { %v353_v26 = vadd.f32 %v352_v25, %v2417_v24 }
 0x186   :  { %2005 = vtanh.f32 %v353_v26 }
 0x193   :  { %v2006_v27 = vpop.eup %2005 }
 0x194   :  { %357 = vrot.lane.b32.xlu0 %v2006_v27, %s2157_s22 }
 0x206   :  { %v358_v30 = vpop.permute.xlu0 %357 }
 0x207   :  { %v360_v33 = vmul.f32 %v358_v30, %v355_v29 }
 0x209   :  { %v2421_v35 = vadd.f32 %v365_v31, %v360_v33 }
 0x20b   :  { %v367_v36 = vpack.c.bf16 %v2421_v35, %v2421_v35  ;;  %v439_v54 = vrot.slane %v2421_v35, 7 }
 0x20d   :  { %369 = vrot.lane.b32.xlu1 %v367_v36, %s2157_s22 }
 0x27f   :  { %v370_v37 = vpop.permute.xlu1 %369 }
 0x280   :  { %1876 = vmatmul.mubr.msk.bf16.vlgmr.msra.gmra.mxu0 %vm204_vm5, %v370_v37 }
 0x281   :  { %538 = vmatpush1.bf16.msra.mxu0 %v2239_v1  ;;  %561 = vmatprep.mubr.bf16.mxu0 %v2156_v17 }
 0x282   :  { %539 = vmatprep.subr.bf16.mxu0 %v2253_v3 }
 0x285   :  { %540 = vmatpush1.bf16.msra.mxu0 %v2266_v5 }
 0x286   :  { %541 = vmatprep.subr.bf16.mxu0 %v2296_v12 }
 0x289   :  { %542 = vmatpush1.bf16.msra.mxu0 %v2319_v22 }
 0x28a   :  { %543 = vmatprep.subr.bf16.mxu0 %v2338_v32 }
 0x28d   :  { %544 = vmatpush1.bf16.msra.mxu0 %v2346_v34 }
 0x28e   :  { %693 = vmatprep.subr.bf16.mxu0 %v2232_v0 }
 0x340   :  { %v408_v38 = vpop.f32.mrf.mxu0 }
 0x341   :  { %v416_v39 = vrot.slane %v408_v38, 7 }
 0x342   :  { %v410_v40 = vpop.f32.mrf.mxu0 }
 0x343   :  { %v418_v41 = vadd.f32 %v416_v39, %v2405_v8  ;;  %v425_v47 = vadd.f32 %v410_v40, %v2412_v19 }
 0x344   :  { %v412_v42 = vpop.f32.mrf.mxu0 }
 0x345   :  { %v1877_v43 = vmul.f32 -1.442695, %v418_v41  ;;  %v427_v48 = vrot.slane %v425_v47, 7 }
 0x346   :  { %v413_v44 = vpop.f32.mrf.mxu0 }
 0x347   :  { %2007 = vpow2.f32 %v1877_v43 }
 0x354   :  { %v2008_v45 = vpop.eup %2007 }
 0x355   :  { %v422_v46 = vadd.f32 1.0, %v2008_v45 }
 0x357   :  { %2009 = vrcp.f32 %v422_v46 }
 0x364   :  { %v2010_v49 = vpop.eup %2009 }
 0x365   :  { %v429_v50 = vmul.f32 %v2010_v49, %v427_v48  ;;  %v432_v53 = vsub.f32 1.0, %v2010_v49  ;;  %v441_v56 = vmul.f32 %v2010_v49, %v439_v54 }
 0x367   :  { %v430_v51 = vadd.f32 %v429_v50, %v2417_v24 }
 0x369   :  { %2011 = vtanh.f32 %v430_v51 }
 0x376   :  { %v2012_v52 = vpop.eup %2011 }
 0x377   :  { %434 = vrot.lane.b32.xlu0 %v2012_v52, %s2157_s22 }
 0x3e9   :  { %v435_v55 = vpop.permute.xlu0 %434 }
 0x3ea   :  { %v437_v57 = vmul.f32 %v435_v55, %v432_v53 }
 0x3ec   :  { %v2441_v58 = vadd.f32 %v441_v56, %v437_v57 }
 0x3ee   :  { %v443_v59 = vpack.c.bf16 %v2441_v58, %v2441_v58  ;;  %v517_v20 = vrot.slane %v2441_v58, 7  ;;  %v910_v33 = vsel %vm101_vm0, %v2421_v35, %v2441_v58 }
 0x3f0   :  { %v445_v60 = vshrl.u32 %v443_v59, 16 }
 0x3f2   :  { %447 = vrot.lane.b32.xlu1 %v445_v60, %s2157_s22 }
 0x464   :  { %v448_v61 = vpop.permute.xlu1 %447 }
 0x465   :  { %1878 = vmatmul.mubr.msk.bf16.vlgmr.msra.gmra.mxu1 %vm204_vm5, %v448_v61 }
 0x466   :  { %617 = vmatpush1.bf16.msra.mxu1 %v2239_v1  ;;  %640 = vmatprep.mubr.bf16.mxu1 %v2156_v17 }
 0x467   :  { %618 = vmatprep.subr.bf16.mxu1 %v2253_v3 }
 0x46a   :  { %619 = vmatpush1.bf16.msra.mxu1 %v2266_v5 }
 0x46b   :  { %620 = vmatprep.subr.bf16.mxu1 %v2296_v12 }
 0x46e   :  { %621 = vmatpush1.bf16.msra.mxu1 %v2319_v22 }
 0x46f   :  { %622 = vmatprep.subr.bf16.mxu1 %v2338_v32 }
 0x472   :  { %623 = vmatpush1.bf16.msra.mxu1 %v2346_v34 }
 0x473   :  { %772 = vmatprep.subr.bf16.mxu1 %v2232_v0 }
 0x525   :  { %v486_v62 = vpop.f32.mrf.mxu1 }
 0x526   :  { %v494_v4 = vrot.slane %v486_v62, 6 }
 0x527   :  { %v488_v6 = vpop.f32.mrf.mxu1 }
 0x528   :  { %v496_v7 = vadd.f32 %v494_v4, %v2405_v8  ;;  %v503_v15 = vadd.f32 %v488_v6, %v2412_v19 }
 0x529   :  { %v490_v9 = vpop.f32.mrf.mxu1 }
 0x52a   :  { %v1879_v10 = vmul.f32 -1.442695, %v496_v7  ;;  %v505_v16 = vrot.slane %v503_v15, 6 }
 0x52b   :  { %v491_v11 = vpop.f32.mrf.mxu1 }
 0x52c   :  { %2013 = vpow2.f32 %v1879_v10 }
 0x539   :  { %v2014_v13 = vpop.eup %2013 }
 0x53a   :  { %v500_v14 = vadd.f32 1.0, %v2014_v13 }
 0x53c   :  { %2015 = vrcp.f32 %v500_v14 }
 0x549   :  { %v2016_v21 = vpop.eup %2015 }
 0x54a   :  { %v507_v23 = vmul.f32 %v2016_v21, %v505_v16  ;;  %v519_v25 = vmul.f32 %v2016_v21, %v517_v20  ;;  %v510_v28 = vsub.f32 1.0, %v2016_v21 }
 0x54c   :  { %v508_v26 = vadd.f32 %v507_v23, %v2417_v24 }
 0x54e   :  { %2017 = vtanh.f32 %v508_v26 }
 0x55b   :  { %v2018_v27 = vpop.eup %2017 }
 0x55c   :  { %512 = vrot.lane.b32.xlu0 %v2018_v27, %s2157_s22 }
 0x5ce   :  { %v513_v29 = vpop.permute.xlu0 %512 }
 0x5cf   :  { %v515_v30 = vmul.f32 %v513_v29, %v510_v28 }
 0x5d1   :  { %v2461_v31 = vadd.f32 %v519_v25, %v515_v30 }
 0x5d3   :  { %v521_v36 = vpack.c.bf16 %v2461_v31, %v2461_v31  ;;  %v911_v37 = vsel %vm103_vm1, %v910_v33, %v2461_v31  ;;  %v594_v51 = vrot.slane %v2461_v31, 7 }
 0x5d5   :  { %v523_v38 = vrot.slane %v521_v36, 1 }
 0x5d7   :  { %524 = vrot.lane.b32.xlu1 %v523_v38, %s2157_s22 }
 0x649   :  { %v525_v39 = vpop.permute.xlu1 %524 }
 0x64a   :  { %1880 = vmatmul.mubr.msk.bf16.vlgmr.msra.gmra.mxu0 %vm204_vm5, %v525_v39 }
 0x64b   :  { %694 = vmatpush1.bf16.msra.mxu0 %v2239_v1  ;;  %717 = vmatprep.mubr.bf16.mxu0 %v2156_v17 }
 0x64c   :  { %695 = vmatprep.subr.bf16.mxu0 %v2253_v3 }
 0x64f   :  { %696 = vmatpush1.bf16.msra.mxu0 %v2266_v5 }
 0x650   :  { %697 = vmatprep.subr.bf16.mxu0 %v2296_v12 }
 0x653   :  { %698 = vmatpush1.bf16.msra.mxu0 %v2319_v22 }
 0x654   :  { %699 = vmatprep.subr.bf16.mxu0 %v2338_v32 }
 0x657   :  { %700 = vmatpush1.bf16.msra.mxu0 %v2346_v34 }
 0x658   :  { %849 = vmatprep.subr.bf16.mxu0 %v2232_v0 }
 0x70a   :  { %v563_v40 = vpop.f32.mrf.mxu0 }
 0x70b   :  { %v571_v41 = vrot.slane %v563_v40, 5 }
 0x70c   :  { %v565_v42 = vpop.f32.mrf.mxu0 }
 0x70d   :  { %v573_v43 = vadd.f32 %v571_v41, %v2405_v8  ;;  %v580_v49 = vadd.f32 %v565_v42, %v2412_v19 }
 0x70e   :  { %v567_v44 = vpop.f32.mrf.mxu0 }
 0x70f   :  { %v1881_v45 = vmul.f32 -1.442695, %v573_v43  ;;  %v582_v50 = vrot.slane %v580_v49, 5 }
 0x710   :  { %v568_v46 = vpop.f32.mrf.mxu0 }
 0x711   :  { %2019 = vpow2.f32 %v1881_v45 }
 0x71e   :  { %v2020_v47 = vpop.eup %2019 }
 0x71f   :  { %v577_v48 = vadd.f32 1.0, %v2020_v47 }
 0x721   :  { %2021 = vrcp.f32 %v577_v48 }
 0x72e   :  { %v2022_v52 = vpop.eup %2021 }
 0x72f   :  { %v584_v53 = vmul.f32 %v2022_v52, %v582_v50  ;;  %v596_v0 = vmul.f32 %v2022_v52, %v594_v51  ;;  %v587_v56 = vsub.f32 1.0, %v2022_v52 }
 0x731   :  { %v585_v54 = vadd.f32 %v584_v53, %v2417_v24 }
 0x733   :  { %2023 = vtanh.f32 %v585_v54 }
 0x740   :  { %v2024_v55 = vpop.eup %2023 }
 0x741   :  { %589 = vrot.lane.b32.xlu0 %v2024_v55, %s2157_s22 }
 0x7b3   :  { %v590_v57 = vpop.permute.xlu0 %589 }
 0x7b4   :  { %v592_v59 = vmul.f32 %v590_v57, %v587_v56 }
 0x7b6   :  { %v2486_v60 = vadd.f32 %v596_v0, %v592_v59 }
 0x7b8   :  { %v912_v61 = vsel %vm105_vm2, %v911_v37, %v2486_v60  ;;  %v598_v62 = vpack.c.bf16 %v2486_v60, %v2486_v60  ;;  %v673_v33 = vrot.slane %v2486_v60, 7  ;;  %v2606_v60 = vld [vmem:[%s2886_s9 + $0x20] ss:$8 sps:$4 sm:$0xff]  }
 0x7ba   :  { %v600_v4 = vshrl.u32 %v598_v62, 16 }
 0x7bc   :  { %v602_v6 = vrot.slane %v600_v4, 1 }
 0x7be   :  { %603 = vrot.lane.b32.xlu1 %v602_v6, %s2157_s22 }
 0x830   :  { %v604_v7 = vpop.permute.xlu1 %603 }
 0x831   :  { %1882 = vmatmul.mubr.msk.bf16.vlgmr.msra.gmra.mxu1 %vm204_vm5, %v604_v7 }
 0x832   :  { %773 = vmatpush1.bf16.msra.mxu1 %v2239_v1  ;;  %796 = vmatprep.mubr.bf16.mxu1 %v2156_v17 }
 0x833   :  { %774 = vmatprep.subr.bf16.mxu1 %v2253_v3 }
 0x836   :  { %775 = vmatpush1.bf16.msra.mxu1 %v2266_v5 }
 0x837   :  { %776 = vmatprep.subr.bf16.mxu1 %v2296_v12 }
 0x83a   :  { %777 = vmatpush1.bf16.msra.mxu1 %v2319_v22 }
 0x83b   :  { %778 = vmatprep.subr.bf16.mxu1 %v2338_v32 }
 0x83e   :  { %779 = vmatpush1.bf16.msra.mxu1 %v2346_v34 }
 0x8f1   :  { %v642_v9 = vpop.f32.mrf.mxu1 }
 0x8f2   :  { %v650_v10 = vrot.slane %v642_v9, 4 }
 0x8f3   :  { %v644_v11 = vpop.f32.mrf.mxu1 }
 0x8f4   :  { %v652_v13 = vadd.f32 %v650_v10, %v2405_v8  ;;  %v659_v23 = vadd.f32 %v644_v11, %v2412_v19 }
 0x8f5   :  { %v646_v14 = vpop.f32.mrf.mxu1 }
 0x8f6   :  { %v1883_v15 = vmul.f32 -1.442695, %v652_v13  ;;  %v661_v25 = vrot.slane %v659_v23, 4 }
 0x8f7   :  { %v647_v16 = vpop.f32.mrf.mxu1 }
 0x8f8   :  { %2025 = vpow2.f32 %v1883_v15 }
 0x905   :  { %v2026_v20 = vpop.eup %2025 }
 0x906   :  { %v656_v21 = vadd.f32 1.0, %v2026_v20 }
 0x908   :  { %2027 = vrcp.f32 %v656_v21 }
 0x915   :  { %v2028_v26 = vpop.eup %2027 }
 0x916   :  { %v663_v27 = vmul.f32 %v2028_v26, %v661_v25  ;;  %v666_v30 = vsub.f32 1.0, %v2028_v26  ;;  %v675_v37 = vmul.f32 %v2028_v26, %v673_v33 }
 0x918   :  { %v664_v28 = vadd.f32 %v663_v27, %v2417_v24 }
 0x91a   :  { %2029 = vtanh.f32 %v664_v28 }
 0x927   :  { %v2030_v29 = vpop.eup %2029 }
 0x928   :  { %668 = vrot.lane.b32.xlu0 %v2030_v29, %s2157_s22 }
 0x99a   :  { %v669_v36 = vpop.permute.xlu0 %668 }
 0x99b   :  { %v671_v38 = vmul.f32 %v669_v36, %v666_v30 }
 0x99d   :  { %v2509_v39 = vadd.f32 %v675_v37, %v671_v38 }
 0x99f   :  { %v913_v40 = vsel %vm107_vm3, %v912_v61, %v2509_v39  ;;  %v677_v41 = vpack.c.bf16 %v2509_v39, %v2509_v39 }
 0x9a1   :  { %v679_v42 = vrot.slane %v677_v41, 2 }
 0x9a3   :  { %680 = vrot.lane.b32.xlu1 %v679_v42, %s2157_s22 }
 0xa15   :  { %v681_v43 = vpop.permute.xlu1 %680 }
 0xa16   :  { %1884 = vmatmul.mubr.msk.bf16.vlgmr.msra.gmra.mxu0 %vm204_vm5, %v681_v43 }
 0xa17   :  { %850 = vmatpush1.bf16.msra.mxu0 %v2239_v1  ;;  %873 = vmatprep.mubr.bf16.mxu0 %v2156_v17 }
 0xa18   :  { %851 = vmatprep.subr.bf16.mxu0 %v2253_v3 }
 0xa1b   :  { %852 = vmatpush1.bf16.msra.mxu0 %v2266_v5 }
 0xa1c   :  { %853 = vmatprep.subr.bf16.mxu0 %v2296_v12 }
 0xa1f   :  { %854 = vmatpush1.bf16.msra.mxu0 %v2319_v22  ;;  %v750_v22 = vrot.slane %v2509_v39, 7 }
 0xa20   :  { %855 = vmatprep.subr.bf16.mxu0 %v2338_v32 }
 0xa23   :  { %856 = vmatpush1.bf16.msra.mxu0 %v2346_v34 }
 0xad6   :  { %v719_v44 = vpop.f32.mrf.mxu0 }
 0xad7   :  { %v727_v45 = vrot.slane %v719_v44, 3 }
 0xad8   :  { %v721_v46 = vpop.f32.mrf.mxu0 }
 0xad9   :  { %v729_v47 = vadd.f32 %v727_v45, %v2405_v8  ;;  %v736_v5 = vadd.f32 %v721_v46, %v2412_v19 }
 0xada   :  { %v723_v1 = vpop.f32.mrf.mxu0 }
 0xadb   :  { %v1885_v48 = vmul.f32 -1.442695, %v729_v47  ;;  %v738_v12 = vrot.slane %v736_v5, 3 }
 0xadc   :  { %v724_v49 = vpop.f32.mrf.mxu0 }
 0xadd   :  { %2031 = vpow2.f32 %v1885_v48 }
 0xaea   :  { %v2032_v3 = vpop.eup %2031 }
 0xaeb   :  { %v733_v50 = vadd.f32 1.0, %v2032_v3 }
 0xaed   :  { %2033 = vrcp.f32 %v733_v50 }
 0xafa   :  { %v2034_v32 = vpop.eup %2033 }
 0xafb   :  { %v740_v51 = vmul.f32 %v2034_v32, %v738_v12  ;;  %v752_v34 = vmul.f32 %v2034_v32, %v750_v22  ;;  %v743_v0 = vsub.f32 1.0, %v2034_v32 }
 0xafd   :  { %v741_v52 = vadd.f32 %v740_v51, %v2417_v24 }
 0xaff   :  { %2035 = vtanh.f32 %v741_v52 }
 0xb0c   :  { %v2036_v53 = vpop.eup %2035 }
 0xb0d   :  { %745 = vrot.lane.b32.xlu0 %v2036_v53, %s2157_s22 }
 0xb7f   :  { %v746_v54 = vpop.permute.xlu0 %745 }
 0xb80   :  { %v748_v55 = vmul.f32 %v746_v54, %v743_v0 }
 0xb82   :  { %v2530_v56 = vadd.f32 %v752_v34, %v748_v55 }
 0xb84   :  { %v754_v57 = vpack.c.bf16 %v2530_v56, %v2530_v56  ;;  %v914_v59 = vsel %vm109_vm4, %v913_v40, %v2530_v56  ;;  %v829_v23 = vrot.slane %v2530_v56, 7 }
 0xb86   :  { %v756_v61 = vshrl.u32 %v754_v57, 16 }
 0xb88   :  { %v758_v62 = vrot.slane %v756_v61, 2  ;;  %v922_v61 = vrot.slane %v2530_v56, 3 }
 0xb8a   :  { %759 = vrot.lane.b32.xlu1 %v758_v62, %s2157_s22  ;;  %v1967_v62 = vld [vmem:[%s2884_s7 + $0x74] ss:$8 sps:$4 sm:$0xff]  }
 0xb8b   :  { %1063 = vmatprep.subr.bf16.mxu1 %v1967_v62 }
 0xbfc   :  { %v760_v4 = vpop.permute.xlu1 %759 }
 0xbfd   :  { %1886 = vmatmul.mubr.msk.bf16.vlgmr.msra.gmra.mxu1 %vm204_vm5, %v760_v4  ;;  %v924_v4 = vrot.slane %v2509_v39, 1 }
 0xbfe   :  { %1095 = vmatprep.mubr.bf16.mxu1 %v2156_v17 }
 0xcbd   :  { %v798_v6 = vpop.f32.mrf.mxu1 }
 0xcbe   :  { %v806_v7 = vrot.slane %v798_v6, 2 }
 0xcbf   :  { %v800_v9 = vpop.f32.mrf.mxu1 }
 0xcc0   :  { %v808_v10 = vadd.f32 %v806_v7, %v2405_v8  ;;  %v815_v20 = vadd.f32 %v800_v9, %v2412_v19  ;;  %v1970_v7 = vld [vmem:[%s2884_s7 + $0x64] ss:$8 sps:$4 sm:$0xff]   ;;  %v2575_v9 = vld [vmem:[%s2886_s9 + $0x34] ss:$8 sps:$4 sm:$0xff]  }
 0xcc1   :  { %v802_v11 = vpop.f32.mrf.mxu1  ;;  %1166 = vmatprep.subr.bf16.mxu0 %v2575_v9 }
 0xcc2   :  { %v1887_v13 = vmul.f32 -1.442695, %v808_v10  ;;  %v817_v21 = vrot.slane %v815_v20, 2  ;;  %v926_v10 = vrot.slane %v2461_v31, 5  ;;  %v1968_v11 = vld [vmem:[%s2884_s7 + $0x60] ss:$8 sps:$4 sm:$0xff]  }
 0xcc3   :  { %v803_v14 = vpop.f32.mrf.mxu1  ;;  %v1973_v31 = vld [vmem:[%s2884_s7 + $0x54] ss:$8 sps:$4 sm:$0xff]   ;;  %v930_v20 = vrot.slane %v2421_v35, 1 }
 0xcc4   :  { %2037 = vpow2.f32 %v1887_v13  ;;  %v2585_v13 = vld [vmem:[%s2886_s9 + $0x30] ss:$8 sps:$4 sm:$0xff]   ;;  %v928_v14 = vrot.slane %v2441_v58, 3 }
 0xcd1   :  { %v2038_v15 = vpop.eup %2037 }
 0xcd2   :  { %v812_v16 = vadd.f32 1.0, %v2038_v15 }
 0xcd4   :  { %2039 = vrcp.f32 %v812_v16  ;;  %v2598_v16 = vld [vmem:[%s2886_s9 + $0x24] ss:$8 sps:$4 sm:$0xff]  }
 0xce1   :  { %v2040_v25 = vpop.eup %2039 }
 0xce2   :  { %v819_v26 = vmul.f32 %v2040_v25, %v817_v21  ;;  %v831_v27 = vmul.f32 %v2040_v25, %v829_v23  ;;  %v822_v30 = vsub.f32 1.0, %v2040_v25  ;;  %v2613_v21 = vld [vmem:[%s2886_s9 + $0x14] ss:$8 sps:$4 sm:$0xff]   ;;  %v1971_v23 = vld [vmem:[%s2884_s7 + $0x50] ss:$8 sps:$4 sm:$0xff]  }
 0xce4   :  { %v820_v28 = vadd.f32 %v819_v26, %v2417_v24  ;;  %v1976_v26 = vld [vmem:[%s2884_s7 + $0x44] ss:$8 sps:$4 sm:$0xff]  }
 0xce6   :  { %2041 = vtanh.f32 %v820_v28  ;;  %v2633_v28 = vld [vmem:[%s2886_s9 + $0x4] ss:$8 sps:$4 sm:$0xff]  }
 0xcf3   :  { %v2042_v29 = vpop.eup %2041 }
 0xcf4   :  { %824 = vrot.lane.b32.xlu0 %v2042_v29, %s2157_s22  ;;  %v1974_v29 = vld [vmem:[%s2884_s7 + $0x40] ss:$8 sps:$4 sm:$0xff]  }
 0xd66   :  { %v825_v36 = vpop.permute.xlu0 %824 }
 0xd67   :  { %v827_v37 = vmul.f32 %v825_v36, %v822_v30  ;;  %v1982_v30 = vld [vmem:[%s2884_s7 + $0x34] ss:$8 sps:$4 sm:$0xff]   ;;  %v2645_v36 = vld [vmem:[%s2886_s9] ss:$8 sps:$4 sm:$0xff]  }
 0xd69   :  { %v832_v38 = vadd.f32 %v831_v27, %v827_v37  ;;  %v2626_v27 = vld [vmem:[%s2886_s9 + $0x10] ss:$8 sps:$4 sm:$0xff]   ;;  %v1105_v37 = vld [vmem:[%s2879_s2 + $0x1] sm:$0x1] }
 0xd6b   :  { %v833_v40 = vpack.c.bf16 %v832_v38, %v832_v38  ;;  %v915_v41 = vsel %vm111_vm6, %v914_v59, %v832_v38  ;;  %v906_v22 = vrot.slane %v832_v38, 7  ;;  %v920_v57 = vrot.slane %v832_v38, 5  ;;  %v1980_v38 = vld [vmem:[%s2884_s7 + $0x30] ss:$8 sps:$4 sm:$0xff]  }
 0xd6d   :  { %v835_v42 = vrot.slane %v833_v40, 3  ;;  %v1988_v40 = vld [vmem:[%s2884_s7 + $0x24] ss:$8 sps:$4 sm:$0xff]  }
 0xd6f   :  { %836 = vrot.lane.b32.xlu1 %v835_v42, %s2157_s22  ;;  %v1986_v42 = vld [vmem:[%s2884_s7 + $0x20] ss:$8 sps:$4 sm:$0xff]  }
 0xde1   :  { %v837_v43 = vpop.permute.xlu1 %836 }
 0xde2   :  { %1888 = vmatmul.mubr.msk.bf16.vlgmr.msra.gmra.mxu0 %vm204_vm5, %v837_v43  ;;  %v1994_v43 = vld [vmem:[%s2884_s7 + $0x14] ss:$8 sps:$4 sm:$0xff]  }
 0xde3   :  { %1190 = vmatprep.mubr.bf16.mxu0 %v2156_v17  ;;  %1167 = vmatpush1.bf16.msra.mxu0 %v2585_v13 }
 0xde4   :  { %1168 = vmatprep.subr.bf16.mxu0 %v2598_v16 }
 0xde7   :  { %1169 = vmatpush1.bf16.msra.mxu0 %v2606_v60 }
 0xde8   :  { %1170 = vmatprep.subr.bf16.mxu0 %v2613_v21 }
 0xdeb   :  { %1171 = vmatpush1.bf16.msra.mxu0 %v2626_v27 }
 0xdec   :  { %1172 = vmatprep.subr.bf16.mxu0 %v2633_v28 }
 0xdef   :  { %1173 = vmatpush1.bf16.msra.mxu0 %v2645_v36 }
 0xdf0   :  { %1237 = vmatprep.subr.bf16.mxu0 %v2575_v9 }
 0xea2   :  { %v875_v44 = vpop.f32.mrf.mxu0 }
 0xea3   :  { %v883_v45 = vrot.slane %v875_v44, 1  ;;  %v1992_v44 = vld [vmem:[%s2884_s7 + $0x10] ss:$8 sps:$4 sm:$0xff]  }
 0xea4   :  { %v877_v46 = vpop.f32.mrf.mxu0 }
 0xea5   :  { %v885_v47 = vadd.f32 %v883_v45, %v2405_v8  ;;  %v892_v5 = vadd.f32 %v877_v46, %v2412_v19  ;;  %v2000_v45 = vld [vmem:[%s2884_s7 + $0x4] ss:$8 sps:$4 sm:$0xff]   ;;  %v1998_v46 = vld [vmem:[%s2884_s7] ss:$8 sps:$4 sm:$0xff]  }
 0xea6   :  { %v879_v1 = vpop.f32.mrf.mxu0 }
 0xea7   :  { %v1889_v48 = vmul.f32 -1.442695, %v885_v47  ;;  %v894_v12 = vrot.slane %v892_v5, 1 }
 0xea8   :  { %v880_v49 = vpop.f32.mrf.mxu0 }
 0xea9   :  { %2043 = vpow2.f32 %v1889_v48 }
 0xeb6   :  { %v2044_v3 = vpop.eup %2043 }
 0xeb7   :  { %v889_v50 = vadd.f32 1.0, %v2044_v3 }
 0xeb9   :  { %2045 = vrcp.f32 %v889_v50 }
 0xec6   :  { %v2046_v32 = vpop.eup %2045 }
 0xec7   :  { %v896_v51 = vmul.f32 %v2046_v32, %v894_v12  ;;  %v908_v34 = vmul.f32 %v2046_v32, %v906_v22  ;;  %v899_v8 = vsub.f32 1.0, %v2046_v32 }
 0xec9   :  { %v897_v52 = vadd.f32 %v896_v51, %v2417_v24  ;;  %v1965_v24 = vld [vmem:[%s2884_s7 + $0x70] ss:$8 sps:$4 sm:$0xff]  }
 0xeca   :  { %1064 = vmatpush1.bf16.msra.mxu1 %v1965_v24 }
 0xecb   :  { %2047 = vtanh.f32 %v897_v52  ;;  %1065 = vmatprep.subr.bf16.mxu1 %v1970_v7  ;;  %v971_v52 = vld [vmem:[%s2885_s8] sm:$0x3]  ;;  %s2159_s8 = smov [#allocation6]  }
 0xece   :  { %1066 = vmatpush1.bf16.msra.mxu1 %v1968_v11 }
 0xecf   :  { %1067 = vmatprep.subr.bf16.mxu1 %v1973_v31 }
 0xed2   :  { %1068 = vmatpush1.bf16.msra.mxu1 %v1971_v23 }
 0xed3   :  { %1069 = vmatprep.subr.bf16.mxu1 %v1976_v26 }
 0xed6   :  { %1070 = vmatpush1.bf16.msra.mxu1 %v1974_v29 }
 0xed7   :  { %1071 = vmatprep.subr.bf16.mxu1 %v1982_v30 }
 0xed8   :  { %v2048_v53 = vpop.eup %2047 }
 0xed9   :  { %901 = vrot.lane.b32.xlu0 %v2048_v53, %s2157_s22  ;;  %v976_v53 = vrot.slane %v971_v52, %v156_v2  ;;  %v980_v2 = vrot.slane %v971_v52, %v160_v18 }
 0xeda   :  { %1072 = vmatpush1.bf16.msra.mxu1 %v1980_v38 }
 0xedb   :  { %1073 = vmatprep.subr.bf16.mxu1 %v1988_v40 }
 0xede   :  { %1074 = vmatpush1.bf16.msra.mxu1 %v1986_v42 }
 0xedf   :  { %1075 = vmatprep.subr.bf16.mxu1 %v1994_v43 }
 0xee2   :  { %1076 = vmatpush1.bf16.msra.mxu1 %v1992_v44 }
 0xee3   :  { %1077 = vmatprep.subr.bf16.mxu1 %v2000_v45 }
 0xee6   :  { %1078 = vmatpush1.bf16.msra.mxu1 %v1998_v46 }
 0xee7   :  { %1315 = vmatprep.subr.bf16.mxu1 %v2575_v9 }
 0xf4b   :  { %v902_v0 = vpop.permute.xlu0 %901 }
 0xf4c   :  { %v904_v54 = vmul.f32 %v902_v0, %v899_v8 }
 0xf4e   :  { %v2552_v55 = vadd.f32 %v908_v34, %v904_v54 }
 0xf50   :  { %v918_v59 = vrot.slane %v2552_v55, 7  ;;  %v916_v19 = vsel %vm113_vm7, %v915_v41, %v2552_v55  ;;  %v1106_v41 = vpack.c.bf16 %v1105_v37, %v1105_v37 }
 0xf52   :  { %v932_v6 = vsel %vm101_vm0, %v918_v59, %v920_v57  ;;  %1914 = vmatmul.mubr.msk.bf16.vlgmr.msra.gmra.mxu0 %vm204_vm5, %v1106_v41 }
 0xf53   :  { %v933_v56 = vsel %vm103_vm1, %v932_v6, %v922_v61  ;;  %1238 = vmatpush1.bf16.msra.mxu0 %v2585_v13  ;;  %1261 = vmatprep.mubr.bf16.mxu0 %v2156_v17  ;;  %v2710_v6 = vld [vmem:[%s2887_s10] sm:$0x1]  ;;  %s1829_s10 = sshll.u32 %s2159_s8, 4  ;;  %s1830_s10 = int_to_ptr.vmem [resolvable:$true] %s1829_s10 }
 0xf54   :  { %v934_v39 = vsel %vm105_vm2, %v933_v56, %v924_v4  ;;  %1239 = vmatprep.subr.bf16.mxu0 %v2598_v16  ;;  %s2109_s14 = scalar_lea.vmem %s1830_s10, 32  ;;  %p2114_p6 = scmp.lt.s32.totalorder %s1830_s10, %s1830_s10 }
 0xf55   :  { %v935_v15 = vsel %vm107_vm3, %v934_v39, %v673_v33  ;;  %p2110_p5 = scmp.ne.s32.totalorder %s1830_s10, %s2109_s14  ;;  %p2115_p7 = scmp.lt.s32.totalorder %s2109_s14, %s2109_s14 }
 0xf56   :  { %v936_v58 = vsel %vm109_vm4, %v935_v15, %v926_v10 }
 0xf57   :  { %v937_v33 = vsel %vm111_vm6, %v936_v58, %v928_v14  ;;  %1240 = vmatpush1.bf16.msra.mxu0 %v2606_v60  ;;  %p2116_p8 = por %p2115_p7, %p2114_p6 }
 0xf58   :  { %v938_v35 = vsel %vm113_vm7, %v937_v33, %v930_v20  ;;  %1241 = vmatprep.subr.bf16.mxu0 %v2613_v21 }
 0xf59   :  { %v1936_v25 = vpack.i.bf16 %v938_v35, %v916_v19  ;;  %p2117_p9 = pnand %p2116_p8, %p2110_p5 }
 0xf5b   :  { %1937 = vrot.lane.b32.xlu1 %v1936_v25, %s2157_s22  ;;  %1242 = vmatpush1.bf16.msra.mxu0 %v2626_v27 }
 0xf5c   :  { %1243 = vmatprep.subr.bf16.mxu0 %v2633_v28 }
 0xf5f   :  { %1244 = vmatpush1.bf16.msra.mxu0 %v2645_v36 }
 0xf60   :  { %1392 = vmatprep.subr.bf16.mxu0 %v2575_v9 }
 0xfcd   :  { %v1938_v47 = vpop.permute.xlu1 %1937 }
 0xfce   :  { %v1940_v1 = vunpack.i.h.bf16 %v1938_v47  ;;  %v1939_v48 = vunpack.i.l.bf16 %v1938_v47 }
 0xfd0   :  { %v948_v49 = vsel %vm141_vm8, %v1940_v1, %v1939_v48  ;;  %v947_v3 = vsel %vm141_vm8, %v1939_v48, %v1940_v1 }
 0xfd1   :  { %950 = vrot.lane.b32.xlu0 %v948_v49, %s2157_s22 }
 0xfd5   :  { %1217 = vrot.lane.b32.xlu0 %v1105_v37, %s2157_s22 }
0x1012   :  { %v1192_v50 = vpop.f32.mrf.mxu0 }
0x1014   :  { %v1194_v5 = vpop.f32.mrf.mxu0 }
0x1015   :  { %v1206_v7 = vadd.f32 %v1194_v5, %v2710_v6 }
0x1016   :  { %v1196_v12 = vpop.f32.mrf.mxu0 }
0x1018   :  { %v1197_v22 = vpop.f32.mrf.mxu0 }
0x1043   :  { %v951_v32 = vpop.permute.xlu0 %950 }
0x1044   :  { %v953_v51 = vsel %vm204_vm5, %v947_v3, %v951_v32 }
0x1045   :  { %v954_v34 = vpack.c.bf16 %v953_v51, %v953_v51 }
0x1047   :  { %1096 = vmatmul.mubr.bf16.vlgmr.msra.gmra.mxu1 %v954_v34  ;;  %v1218_v15 = vpop.permute.xlu0 %1217 }
0x1048   :  { %1316 = vmatpush1.bf16.msra.mxu1 %v2585_v13  ;;  %1339 = vmatprep.mubr.bf16.mxu1 %v2156_v17 }
0x1049   :  { %1317 = vmatprep.subr.bf16.mxu1 %v2598_v16 }
0x104c   :  { %1318 = vmatpush1.bf16.msra.mxu1 %v2606_v60 }
0x104d   :  { %1319 = vmatprep.subr.bf16.mxu1 %v2613_v21 }
0x1050   :  { %1320 = vmatpush1.bf16.msra.mxu1 %v2626_v27 }
0x1051   :  { %1321 = vmatprep.subr.bf16.mxu1 %v2633_v28 }
0x1054   :  { %1322 = vmatpush1.bf16.msra.mxu1 %v2645_v36 }
0x1055   :  { %1471 = vmatprep.subr.bf16.mxu1 %v2575_v9 }
0x1107   :  { %v1097_v8 = vpop.f32.mrf.mxu1 }
0x1108   :  { %v2704_v0 = vadd.f32 %v1097_v8, %v976_v53 }
0x1109   :  { %v1099_v54 = vpop.f32.mrf.mxu1 }
0x110a   :  { %v1199_v57 = vadd.f32 %v1192_v50, %v2704_v0  ;;  %v2715_v10 = vadd.f32 %v1099_v54, %v980_v2 }
0x110b   :  { %v1101_v19 = vpop.f32.mrf.mxu1 }
0x110c   :  { %v1915_v61 = vmul.f32 -1.442695, %v1199_v57 }
0x110d   :  { %v1102_v24 = vpop.f32.mrf.mxu1 }
0x110e   :  { %2049 = vpow2.f32 %v1915_v61 }
0x111b   :  { %v2050_v62 = vpop.eup %2049 }
0x111c   :  { %v1203_v4 = vadd.f32 1.0, %v2050_v62 }
0x111e   :  { %2051 = vrcp.f32 %v1203_v4 }
0x112b   :  { %v2052_v56 = vpop.eup %2051 }
0x112c   :  { %v1207_v39 = vmul.f32 %v2052_v56, %v1206_v7  ;;  %v1210_v31 = vsub.f32 1.0, %v2052_v56  ;;  %v1220_v58 = vmul.f32 %v2052_v56, %v1218_v15 }
0x112e   :  { %v1208_v11 = vadd.f32 %v1207_v39, %v2715_v10 }
0x1130   :  { %2053 = vtanh.f32 %v1208_v11 }
0x113d   :  { %v2054_v14 = vpop.eup %2053 }
0x113e   :  { %1212 = vrot.lane.b32.xlu1 %v2054_v14, %s2157_s22 }
0x11b0   :  { %v1213_v20 = vpop.permute.xlu1 %1212 }
0x11b1   :  { %v1215_v33 = vmul.f32 %v1213_v20, %v1210_v31 }
0x11b3   :  { %v2719_v35 = vadd.f32 %v1220_v58, %v1215_v33 }
0x11b5   :  { %v1222_v63 = vpack.c.bf16 %v2719_v35, %v2719_v35  ;;  %v1294_v48 = vrot.slane %v2719_v35, 7 }
0x11b7   :  { %1224 = vrot.lane.b32.xlu1 %v1222_v63, %s2157_s22 }
0x1229   :  { %v1225_v18 = vpop.permute.xlu1 %1224 }
0x122a   :  { %1916 = vmatmul.mubr.msk.bf16.vlgmr.msra.gmra.mxu0 %vm204_vm5, %v1225_v18 }
0x122b   :  { %1393 = vmatpush1.bf16.msra.mxu0 %v2585_v13  ;;  %1416 = vmatprep.mubr.bf16.mxu0 %v2156_v17 }
0x122c   :  { %1394 = vmatprep.subr.bf16.mxu0 %v2598_v16 }
0x122f   :  { %1395 = vmatpush1.bf16.msra.mxu0 %v2606_v60 }
0x1230   :  { %1396 = vmatprep.subr.bf16.mxu0 %v2613_v21 }
0x1233   :  { %1397 = vmatpush1.bf16.msra.mxu0 %v2626_v27 }
0x1234   :  { %1398 = vmatprep.subr.bf16.mxu0 %v2633_v28 }
0x1237   :  { %1399 = vmatpush1.bf16.msra.mxu0 %v2645_v36 }
0x1238   :  { %1548 = vmatprep.subr.bf16.mxu0 %v2575_v9 }
0x12ea   :  { %v1263_v23 = vpop.f32.mrf.mxu0 }
0x12eb   :  { %v1271_v25 = vrot.slane %v1263_v23, 7 }
0x12ec   :  { %v1265_v26 = vpop.f32.mrf.mxu0 }
0x12ed   :  { %v1273_v29 = vadd.f32 %v1271_v25, %v2704_v0  ;;  %v1280_v42 = vadd.f32 %v1265_v26, %v2710_v6 }
0x12ee   :  { %v1267_v30 = vpop.f32.mrf.mxu0 }
0x12ef   :  { %v1917_v37 = vmul.f32 -1.442695, %v1273_v29  ;;  %v1282_v43 = vrot.slane %v1280_v42, 7 }
0x12f0   :  { %v1268_v38 = vpop.f32.mrf.mxu0 }
0x12f1   :  { %2055 = vpow2.f32 %v1917_v37 }
0x12fe   :  { %v2056_v40 = vpop.eup %2055 }
0x12ff   :  { %v1277_v41 = vadd.f32 1.0, %v2056_v40 }
0x1301   :  { %2057 = vrcp.f32 %v1277_v41 }
0x130e   :  { %v2058_v44 = vpop.eup %2057 }
0x130f   :  { %v1284_v45 = vmul.f32 %v2058_v44, %v1282_v43  ;;  %v1287_v1 = vsub.f32 1.0, %v2058_v44  ;;  %v1296_v3 = vmul.f32 %v2058_v44, %v1294_v48 }
0x1311   :  { %v1285_v46 = vadd.f32 %v1284_v45, %v2715_v10 }
0x1313   :  { %2059 = vtanh.f32 %v1285_v46 }
0x1320   :  { %v2060_v47 = vpop.eup %2059 }
0x1321   :  { %1289 = vrot.lane.b32.xlu0 %v2060_v47, %s2157_s22 }
0x1393   :  { %v1290_v49 = vpop.permute.xlu0 %1289 }
0x1394   :  { %v1292_v50 = vmul.f32 %v1290_v49, %v1287_v1 }
0x1396   :  { %v2739_v5 = vadd.f32 %v1296_v3, %v1292_v50 }
0x1398   :  { %v1298_v12 = vpack.c.bf16 %v2739_v5, %v2739_v5  ;;  %v1372_v4 = vrot.slane %v2739_v5, 7  ;;  %v1765_v58 = vsel %vm101_vm0, %v2719_v35, %v2739_v5 }
0x139a   :  { %v1300_v22 = vshrl.u32 %v1298_v12, 16 }
0x139c   :  { %1302 = vrot.lane.b32.xlu1 %v1300_v22, %s2157_s22 }
0x140e   :  { %v1303_v32 = vpop.permute.xlu1 %1302 }
0x140f   :  { %1918 = vmatmul.mubr.msk.bf16.vlgmr.msra.gmra.mxu1 %vm204_vm5, %v1303_v32 }
0x1410   :  { %1472 = vmatpush1.bf16.msra.mxu1 %v2585_v13  ;;  %1495 = vmatprep.mubr.bf16.mxu1 %v2156_v17 }
0x1411   :  { %1473 = vmatprep.subr.bf16.mxu1 %v2598_v16 }
0x1414   :  { %1474 = vmatpush1.bf16.msra.mxu1 %v2606_v60 }
0x1415   :  { %1475 = vmatprep.subr.bf16.mxu1 %v2613_v21 }
0x1418   :  { %1476 = vmatpush1.bf16.msra.mxu1 %v2626_v27 }
0x1419   :  { %1477 = vmatprep.subr.bf16.mxu1 %v2633_v28 }
0x141c   :  { %1478 = vmatpush1.bf16.msra.mxu1 %v2645_v36 }
0x141d   :  { %1627 = vmatprep.subr.bf16.mxu1 %v2575_v9 }
0x14cf   :  { %v1341_v51 = vpop.f32.mrf.mxu1 }
0x14d0   :  { %v1349_v34 = vrot.slane %v1341_v51, 6 }
0x14d1   :  { %v1343_v52 = vpop.f32.mrf.mxu1 }
0x14d2   :  { %v1351_v53 = vadd.f32 %v1349_v34, %v2704_v0  ;;  %v1358_v24 = vadd.f32 %v1343_v52, %v2710_v6 }
0x14d3   :  { %v1345_v8 = vpop.f32.mrf.mxu1 }
0x14d4   :  { %v1919_v54 = vmul.f32 -1.442695, %v1351_v53  ;;  %v1360_v62 = vrot.slane %v1358_v24, 6 }
0x14d5   :  { %v1346_v57 = vpop.f32.mrf.mxu1 }
0x14d6   :  { %2061 = vpow2.f32 %v1919_v54 }
0x14e3   :  { %v2062_v19 = vpop.eup %2061 }
0x14e4   :  { %v1355_v61 = vadd.f32 1.0, %v2062_v19 }
0x14e6   :  { %2063 = vrcp.f32 %v1355_v61 }
0x14f3   :  { %v2064_v2 = vpop.eup %2063 }
0x14f4   :  { %v1362_v7 = vmul.f32 %v2064_v2, %v1360_v62  ;;  %v1374_v56 = vmul.f32 %v2064_v2, %v1372_v4  ;;  %v1365_v14 = vsub.f32 1.0, %v2064_v2 }
0x14f6   :  { %v1363_v39 = vadd.f32 %v1362_v7, %v2715_v10 }
0x14f8   :  { %2065 = vtanh.f32 %v1363_v39 }
0x1505   :  { %v2066_v11 = vpop.eup %2065 }
0x1506   :  { %1367 = vrot.lane.b32.xlu0 %v2066_v11, %s2157_s22 }
0x1578   :  { %v1368_v15 = vpop.permute.xlu0 %1367 }
0x1579   :  { %v1370_v31 = vmul.f32 %v1368_v15, %v1365_v14 }
0x157b   :  { %v2759_v20 = vadd.f32 %v1374_v56, %v1370_v31 }
0x157d   :  { %v1376_v33 = vpack.c.bf16 %v2759_v20, %v2759_v20  ;;  %v1766_v63 = vsel %vm103_vm1, %v1765_v58, %v2759_v20  ;;  %v1449_v45 = vrot.slane %v2759_v20, 7 }
0x157f   :  { %v1378_v18 = vrot.slane %v1376_v33, 1 }
0x1581   :  { %1379 = vrot.lane.b32.xlu1 %v1378_v18, %s2157_s22 }
0x15f3   :  { %v1380_v23 = vpop.permute.xlu1 %1379 }
0x15f4   :  { %1920 = vmatmul.mubr.msk.bf16.vlgmr.msra.gmra.mxu0 %vm204_vm5, %v1380_v23 }
0x15f5   :  { %1549 = vmatpush1.bf16.msra.mxu0 %v2585_v13  ;;  %1572 = vmatprep.mubr.bf16.mxu0 %v2156_v17 }
0x15f6   :  { %1550 = vmatprep.subr.bf16.mxu0 %v2598_v16 }
0x15f9   :  { %1551 = vmatpush1.bf16.msra.mxu0 %v2606_v60 }
0x15fa   :  { %1552 = vmatprep.subr.bf16.mxu0 %v2613_v21 }
0x15fd   :  { %1553 = vmatpush1.bf16.msra.mxu0 %v2626_v27 }
0x15fe   :  { %1554 = vmatprep.subr.bf16.mxu0 %v2633_v28 }
0x1601   :  { %1555 = vmatpush1.bf16.msra.mxu0 %v2645_v36 }
0x1602   :  { %1704 = vmatprep.subr.bf16.mxu0 %v2575_v9 }
0x16b4   :  { %v1418_v25 = vpop.f32.mrf.mxu0 }
0x16b5   :  { %v1426_v26 = vrot.slane %v1418_v25, 5 }
0x16b6   :  { %v1420_v29 = vpop.f32.mrf.mxu0 }
0x16b7   :  { %v1428_v30 = vadd.f32 %v1426_v26, %v2704_v0  ;;  %v1435_v43 = vadd.f32 %v1420_v29, %v2710_v6 }
0x16b8   :  { %v1422_v37 = vpop.f32.mrf.mxu0 }
0x16b9   :  { %v1921_v38 = vmul.f32 -1.442695, %v1428_v30  ;;  %v1437_v44 = vrot.slane %v1435_v43, 5 }
0x16ba   :  { %v1423_v40 = vpop.f32.mrf.mxu0 }
0x16bb   :  { %2067 = vpow2.f32 %v1921_v38 }
0x16c8   :  { %v2068_v41 = vpop.eup %2067 }
0x16c9   :  { %v1432_v42 = vadd.f32 1.0, %v2068_v41 }
0x16cb   :  { %2069 = vrcp.f32 %v1432_v42 }
0x16d8   :  { %v2070_v46 = vpop.eup %2069 }
0x16d9   :  { %v1439_v47 = vmul.f32 %v2070_v46, %v1437_v44  ;;  %v1451_v9 = vmul.f32 %v2070_v46, %v1449_v45  ;;  %v1442_v49 = vsub.f32 1.0, %v2070_v46 }
0x16db   :  { %v1440_v1 = vadd.f32 %v1439_v47, %v2715_v10 }
0x16dd   :  { %2071 = vtanh.f32 %v1440_v1 }
0x16ea   :  { %v2072_v48 = vpop.eup %2071 }
0x16eb   :  { %1444 = vrot.lane.b32.xlu0 %v2072_v48, %s2157_s22 }
0x175d   :  { %v1445_v3 = vpop.permute.xlu0 %1444 }
0x175e   :  { %v1447_v50 = vmul.f32 %v1445_v3, %v1442_v49 }
0x1760   :  { %v2784_v12 = vadd.f32 %v1451_v9, %v1447_v50 }
0x1762   :  { %v1767_v22 = vsel %vm105_vm2, %v1766_v63, %v2784_v12  ;;  %v1453_v32 = vpack.c.bf16 %v2784_v12, %v2784_v12  ;;  %v1528_v31 = vrot.slane %v2784_v12, 7 }
0x1764   :  { %v1455_v51 = vshrl.u32 %v1453_v32, 16 }
0x1766   :  { %v1457_v34 = vrot.slane %v1455_v51, 1 }
0x1768   :  { %1458 = vrot.lane.b32.xlu1 %v1457_v34, %s2157_s22 }
0x17da   :  { %v1459_v52 = vpop.permute.xlu1 %1458 }
0x17db   :  { %1922 = vmatmul.mubr.msk.bf16.vlgmr.msra.gmra.mxu1 %vm204_vm5, %v1459_v52 }
0x17dc   :  { %1628 = vmatpush1.bf16.msra.mxu1 %v2585_v13  ;;  %1651 = vmatprep.mubr.bf16.mxu1 %v2156_v17 }
0x17dd   :  { %1629 = vmatprep.subr.bf16.mxu1 %v2598_v16 }
0x17e0   :  { %1630 = vmatpush1.bf16.msra.mxu1 %v2606_v60 }
0x17e1   :  { %1631 = vmatprep.subr.bf16.mxu1 %v2613_v21 }
0x17e4   :  { %1632 = vmatpush1.bf16.msra.mxu1 %v2626_v27 }
0x17e5   :  { %1633 = vmatprep.subr.bf16.mxu1 %v2633_v28 }
0x17e8   :  { %1634 = vmatpush1.bf16.msra.mxu1 %v2645_v36 }
0x189b   :  { %v1497_v53 = vpop.f32.mrf.mxu1 }
0x189c   :  { %v1505_v8 = vrot.slane %v1497_v53, 4 }
0x189d   :  { %v1499_v54 = vpop.f32.mrf.mxu1 }
0x189e   :  { %v1507_v57 = vadd.f32 %v1505_v8, %v2704_v0  ;;  %v1514_v2 = vadd.f32 %v1499_v54, %v2710_v6 }
0x189f   :  { %v1501_v19 = vpop.f32.mrf.mxu1 }
0x18a0   :  { %v1923_v61 = vmul.f32 -1.442695, %v1507_v57  ;;  %v1516_v7 = vrot.slane %v1514_v2, 4 }
0x18a1   :  { %v1502_v24 = vpop.f32.mrf.mxu1 }
0x18a2   :  { %2073 = vpow2.f32 %v1923_v61 }
0x18af   :  { %v2074_v62 = vpop.eup %2073 }
0x18b0   :  { %v1511_v4 = vadd.f32 1.0, %v2074_v62 }
0x18b2   :  { %2075 = vrcp.f32 %v1511_v4 }
0x18bf   :  { %v2076_v56 = vpop.eup %2075 }
0x18c0   :  { %v1518_v39 = vmul.f32 %v2076_v56, %v1516_v7  ;;  %v1521_v15 = vsub.f32 1.0, %v2076_v56  ;;  %v1530_v33 = vmul.f32 %v2076_v56, %v1528_v31 }
0x18c2   :  { %v1519_v11 = vadd.f32 %v1518_v39, %v2715_v10 }
0x18c4   :  { %2077 = vtanh.f32 %v1519_v11 }
0x18d1   :  { %v2078_v14 = vpop.eup %2077 }
0x18d2   :  { %1523 = vrot.lane.b32.xlu0 %v2078_v14, %s2157_s22 }
0x1944   :  { %v1524_v58 = vpop.permute.xlu0 %1523 }
0x1945   :  { %v1526_v63 = vmul.f32 %v1524_v58, %v1521_v15 }
0x1947   :  { %v2807_v18 = vadd.f32 %v1530_v33, %v1526_v63 }
0x1949   :  { %v1532_v23 = vpack.c.bf16 %v2807_v18, %v2807_v18  ;;  %v1768_v25 = vsel %vm107_vm3, %v1767_v22, %v2807_v18 }
0x194b   :  { %v1534_v26 = vrot.slane %v1532_v23, 2 }
0x194d   :  { %1535 = vrot.lane.b32.xlu1 %v1534_v26, %s2157_s22 }
0x19bf   :  { %v1536_v29 = vpop.permute.xlu1 %1535 }
0x19c0   :  { %1924 = vmatmul.mubr.msk.bf16.vlgmr.msra.gmra.mxu0 %vm204_vm5, %v1536_v29 }
0x19c1   :  { %1705 = vmatpush1.bf16.msra.mxu0 %v2585_v13  ;;  %1728 = vmatprep.mubr.bf16.mxu0 %v2156_v17 }
0x19c2   :  { %1706 = vmatprep.subr.bf16.mxu0 %v2598_v16 }
0x19c5   :  { %1707 = vmatpush1.bf16.msra.mxu0 %v2606_v60 }
0x19c6   :  { %1708 = vmatprep.subr.bf16.mxu0 %v2613_v21 }
0x19c9   :  { %1709 = vmatpush1.bf16.msra.mxu0 %v2626_v27  ;;  %v1605_v27 = vrot.slane %v2807_v18, 7 }
0x19ca   :  { %1710 = vmatprep.subr.bf16.mxu0 %v2633_v28 }
0x19cd   :  { %1711 = vmatpush1.bf16.msra.mxu0 %v2645_v36 }
0x1a80   :  { %v1574_v30 = vpop.f32.mrf.mxu0 }
0x1a81   :  { %v1582_v37 = vrot.slane %v1574_v30, 3 }
0x1a82   :  { %v1576_v38 = vpop.f32.mrf.mxu0 }
0x1a83   :  { %v1584_v40 = vadd.f32 %v1582_v37, %v2704_v0  ;;  %v1591_v60 = vadd.f32 %v1576_v38, %v2710_v6 }
0x1a84   :  { %v1578_v13 = vpop.f32.mrf.mxu0 }
0x1a85   :  { %v1925_v41 = vmul.f32 -1.442695, %v1584_v40  ;;  %v1593_v21 = vrot.slane %v1591_v60, 3 }
0x1a86   :  { %v1579_v17 = vpop.f32.mrf.mxu0 }
0x1a87   :  { %2079 = vpow2.f32 %v1925_v41 }
0x1a94   :  { %v2080_v16 = vpop.eup %2079 }
0x1a95   :  { %v1588_v42 = vadd.f32 1.0, %v2080_v16 }
0x1a97   :  { %2081 = vrcp.f32 %v1588_v42 }
0x1aa4   :  { %v2082_v28 = vpop.eup %2081 }
0x1aa5   :  { %v1595_v43 = vmul.f32 %v2082_v28, %v1593_v21  ;;  %v1607_v36 = vmul.f32 %v2082_v28, %v1605_v27  ;;  %v1598_v46 = vsub.f32 1.0, %v2082_v28 }
0x1aa7   :  { %v1596_v44 = vadd.f32 %v1595_v43, %v2715_v10 }
0x1aa9   :  { %2083 = vtanh.f32 %v1596_v44 }
0x1ab6   :  { %v2084_v45 = vpop.eup %2083 }
0x1ab7   :  { %1600 = vrot.lane.b32.xlu0 %v2084_v45, %s2157_s22 }
0x1b29   :  { %v1601_v47 = vpop.permute.xlu0 %1600 }
0x1b2a   :  { %v1603_v9 = vmul.f32 %v1601_v47, %v1598_v46 }
0x1b2c   :  { %v2828_v1 = vadd.f32 %v1607_v36, %v1603_v9 }
0x1b2e   :  { %v1609_v48 = vpack.c.bf16 %v2828_v1, %v2828_v1  ;;  %v1769_v49 = vsel %vm109_vm4, %v1768_v25, %v2828_v1  ;;  %v1684_v62 = vrot.slane %v2828_v1, 7 }
0x1b30   :  { %v1611_v3 = vshrl.u32 %v1609_v48, 16 }
0x1b32   :  { %v1613_v50 = vrot.slane %v1611_v3, 2  ;;  %v1779_v3 = vrot.slane %v2807_v18, 1 }
0x1b34   :  { %1614 = vrot.lane.b32.xlu1 %v1613_v50, %s2157_s22 }
0x1ba6   :  { %v1615_v22 = vpop.permute.xlu1 %1614 }
0x1ba7   :  { %1926 = vmatmul.mubr.msk.bf16.vlgmr.msra.gmra.mxu1 %vm204_vm5, %v1615_v22  ;;  %v1781_v22 = vrot.slane %v2759_v20, 5 }
0x1c67   :  { %v1653_v32 = vpop.f32.mrf.mxu1 }
0x1c68   :  { %v1661_v51 = vrot.slane %v1653_v32, 2 }
0x1c69   :  { %v1655_v34 = vpop.f32.mrf.mxu1 }
0x1c6a   :  { %v1663_v52 = vadd.f32 %v1661_v51, %v2704_v0  ;;  %v1670_v61 = vadd.f32 %v1655_v34, %v2710_v6  ;;  %v1785_v34 = vrot.slane %v2719_v35, 1 }
0x1c6b   :  { %v1657_v53 = vpop.f32.mrf.mxu1 }
0x1c6c   :  { %v1927_v8 = vmul.f32 -1.442695, %v1663_v52  ;;  %v1672_v24 = vrot.slane %v1670_v61, 2 }
0x1c6d   :  { %v1658_v54 = vpop.f32.mrf.mxu1 }
0x1c6e   :  { %2085 = vpow2.f32 %v1927_v8 }
0x1c7b   :  { %v2086_v57 = vpop.eup %2085 }
0x1c7c   :  { %v1667_v19 = vadd.f32 1.0, %v2086_v57 }
0x1c7e   :  { %2087 = vrcp.f32 %v1667_v19 }
0x1c8b   :  { %v2088_v4 = vpop.eup %2087 }
0x1c8c   :  { %v1674_v2 = vmul.f32 %v2088_v4, %v1672_v24  ;;  %v1686_v7 = vmul.f32 %v2088_v4, %v1684_v62  ;;  %v1677_v11 = vsub.f32 1.0, %v2088_v4 }
0x1c8e   :  { %v1675_v56 = vadd.f32 %v1674_v2, %v2715_v10 }
0x1c90   :  { %2089 = vtanh.f32 %v1675_v56 }
0x1c9d   :  { %v2090_v39 = vpop.eup %2089 }
0x1c9e   :  { %1679 = vrot.lane.b32.xlu0 %v2090_v39, %s2157_s22 }
0x1d10   :  { %v1680_v14 = vpop.permute.xlu0 %1679 }
0x1d11   :  { %v1682_v15 = vmul.f32 %v1680_v14, %v1677_v11 }
0x1d13   :  { %v1687_v58 = vadd.f32 %v1686_v7, %v1682_v15 }
0x1d15   :  { %v1688_v33 = vpack.c.bf16 %v1687_v58, %v1687_v58  ;;  %v1770_v63 = vsel %vm111_vm6, %v1769_v49, %v1687_v58  ;;  %v1761_v60 = vrot.slane %v1687_v58, 7  ;;  %v1775_v47 = vrot.slane %v1687_v58, 5 }
0x1d16   :  { %v1777_v49 = vrot.slane %v2828_v1, 3  ;;  %v1783_v1 = vrot.slane %v2739_v5, 3 }
0x1d17   :  { %v1690_v23 = vrot.slane %v1688_v33, 3 }
0x1d19   :  { %1691 = vrot.lane.b32.xlu1 %v1690_v23, %s2157_s22 }
0x1d8b   :  { %v1692_v25 = vpop.permute.xlu1 %1691 }
0x1d8c   :  { %1928 = vmatmul.mubr.msk.bf16.vlgmr.msra.gmra.mxu0 %vm204_vm5, %v1692_v25 }
0x1e4c   :  { %v1730_v26 = vpop.f32.mrf.mxu0 }
0x1e4d   :  { %v1738_v29 = vrot.slane %v1730_v26, 1 }
0x1e4e   :  { %v1732_v30 = vpop.f32.mrf.mxu0 }
0x1e4f   :  { %v1740_v37 = vadd.f32 %v1738_v29, %v2704_v0  ;;  %v1747_v16 = vadd.f32 %v1732_v30, %v2710_v6 }
0x1e50   :  { %v1734_v38 = vpop.f32.mrf.mxu0 }
0x1e51   :  { %v1929_v40 = vmul.f32 -1.442695, %v1740_v37  ;;  %v1749_v42 = vrot.slane %v1747_v16, 1 }
0x1e52   :  { %v1735_v13 = vpop.f32.mrf.mxu0 }
0x1e53   :  { %2091 = vpow2.f32 %v1929_v40 }
0x1e60   :  { %v2092_v41 = vpop.eup %2091 }
0x1e61   :  { %v1744_v17 = vadd.f32 1.0, %v2092_v41 }
0x1e63   :  { %2093 = vrcp.f32 %v1744_v17 }
0x1e70   :  { %v2094_v21 = vpop.eup %2093 }
0x1e71   :  { %v1751_v27 = vmul.f32 %v2094_v21, %v1749_v42  ;;  %v1763_v28 = vmul.f32 %v2094_v21, %v1761_v60  ;;  %v1754_v0 = vsub.f32 1.0, %v2094_v21 }
0x1e73   :  { %v1752_v43 = vadd.f32 %v1751_v27, %v2715_v10 }
0x1e75   :  { %2095 = vtanh.f32 %v1752_v43 }
0x1e82   :  { %v2096_v36 = vpop.eup %2095 }
0x1e83   :  { %1756 = vrot.lane.b32.xlu0 %v2096_v36, %s2157_s22 }
0x1ef5   :  { %v1757_v44 = vpop.permute.xlu0 %1756 }
0x1ef6   :  { %v1759_v45 = vmul.f32 %v1757_v44, %v1754_v0 }
0x1ef8   :  { %v1764_v46 = vadd.f32 %v1763_v28, %v1759_v45 }
0x1efa   :  { %v1773_v9 = vrot.slane %v1764_v46, 7  ;;  %v1771_v48 = vsel %vm113_vm7, %v1770_v63, %v1764_v46  ;;  %v1804_v6 = vrot.slane %v1764_v46, 6 }
0x1efb   :  { %1795 = vrot.lane.b32.xlu1 %v1771_v48, %s2157_s22 }
0x1efc   :  { %v1787_v10 = vsel %vm101_vm0, %v1773_v9, %v1775_v47  ;;  %v1806_v32 = vsel %vm101_vm0, %v918_v59, %v1804_v6 }
0x1efd   :  { %v1788_v50 = vsel %vm103_vm1, %v1787_v10, %v1777_v49 }
0x1efe   :  { %v1789_v51 = vsel %vm105_vm2, %v1788_v50, %v1779_v3 }
0x1eff   :  { %1808 = vrot.lane.b32.xlu1 %v1806_v32, %s2157_s22  ;;  %v1790_v18 = vsel %vm107_vm3, %v1789_v51, %v1528_v31 }
0x1f00   :  { %v1791_v52 = vsel %vm109_vm4, %v1790_v18, %v1781_v22 }
0x1f01   :  { %v1792_v20 = vsel %vm111_vm6, %v1791_v52, %v1783_v1 }
0x1f02   :  { %v1793_v55 = vsel %vm113_vm7, %v1792_v20, %v1785_v34 }
0x1f03   :  { %1799 = vrot.lane.b32.xlu0 %v1793_v55, %s2157_s22 }
0x1f6d   :  { %v1796_v59 = vpop.permute.xlu1 %1795 }
0x1f71   :  { %v1809_v5 = vpop.permute.xlu1 %1808 }
0x1f72   :  { %1812 = vst.msk [vmem:[#allocation6] sm:$0x3] %vm1811_vm9, %v1809_v5 }
0x1f73   :  { %2120 = shalt.err (!%p2117_p9)
}
0x1f74   :  { %1832 = dma.vmem_to_hbm [thread:$0]  %s1830_s10, 32, %s2889_s12, [#allocation7]  }
0x1f75   :  { %v1800_v35 = vpop.permute.xlu0 %1799  ;;  %s2129_s22 = scalar_lea.vmem %s1820_s29, 128  ;;  %p2134_p11 = scmp.lt.s32.totalorder %s1820_s29, %s1820_s29 }
0x1f76   :  { %v1802_v12 = vsel %vm141_vm8, %v1796_v59, %v1800_v35  ;;  %p2130_p10 = scmp.ne.s32.totalorder %s1820_s29, %s2129_s22  ;;  %p2135_p12 = scmp.lt.s32.totalorder %s2129_s22, %s2129_s22 }
0x1f77   :  { %1803 = vst.msk [vmem:[#allocation5] sm:$0xff] %vm204_vm5, %v1802_v12 }
0x1f78   :  { %p2136_p13 = por %p2135_p12, %p2134_p11 }
0x1f7a   :  { %p2137_p0 = pnand %p2136_p13, %p2130_p10 }
0x1f7c   :  { %2140 = shalt.err (!%p2137_p0)
}
0x1f7d   :  { %1822 = dma.vmem_to_hbm [thread:$0]  %s1820_s29, 128, %s2888_s11, [#allocation3]  }
0x1f7e   :  { %2151 = dma.done.wait [#allocation3], 128  }
0x1f7f   :  { %2152 = vsyncadd [#allocation3], 4294967168 }
0x1f80   :  { %2153 = dma.done.wait [#allocation7], 32  }
0x1f81   :  { %2154 = vsyncadd [#allocation7], 4294967264 }
0x1f82   :  { %1839 = vsyncpa [#allocation3], 1 }
0x1f83   :  { %1840 = vsyncpa [#allocation7], 1 }
0x1f84   :  { %1841 = vsyncpa [#allocation4], 1 }

</bundles_post_ra>
